<compile_context>
chip_gen: v7x
topology: tpu7x:2x2x1
jax: 0.10.0
libtpu: 0.0.40
codegen_flags: <defaults>
</compile_context>

<pallas_src>
import math

import jax
import jax.numpy as jnp
from jax.experimental import pallas as pl
from jax.experimental.pallas import tpu as pltpu


# ----------------------------------------------------------------------------- #
# Fused whole-model Pallas kernel
# ----------------------------------------------------------------------------- #
def make_npi_dgcn_kernel(D, Nn, Np, h0, h1, inter, use_intra,
                         adj_first_1, adj_first_2, mxu_dtype):
    """Build the fused kernel.

    Ref order (must match npi_dgcn_pallas):
      Xn(D,Nn,in), Xp(D,Np,in),
      adj1_n, adj1_p, w1_n, w1_p, b1_n(D,1,h0), b1_p(D,1,h0),
      [wb1_n(h0,(D-1)h0), wb1_p]                               (only if use_intra)
      adj2_n, adj2_p, w2_n, w2_p, b2_n(D,1,h1), b2_p(D,1,h1),
      [wb2_n(h1,(D-1)h1), wb2_p]                               (only if use_intra)
      wln(D*h1,h1), bln(1,h1), wlp(D*h1,h1), blp(1,h1),
      out_n(Nn,h1), out_p(Np,h1)
    """
    f32 = jnp.float32

    def kernel(*refs):
        it = iter(refs)

        def take(n):
            return [next(it) for _ in range(n)]

        xn_ref, xp_ref, a1n, a1p, w1n, w1p, b1n, b1p = take(8)
        wb1n, wb1p = (take(2) if use_intra else (None, None))
        a2n, a2p, w2n, w2p, b2n, b2p = take(6)
        wb2n, wb2p = (take(2) if use_intra else (None, None))
        wln, bln, wlp, blp = take(4)
        on_ref, op_ref = take(2)

        def dot(a, b):
            # MXU inputs optionally narrowed; accumulation always f32.
            return jnp.dot(a.astype(mxu_dtype), b.astype(mxu_dtype),
                           preferred_element_type=f32)

        def run_layer(xs_n, xs_p, adj_n, adj_p, w_n, w_p, b_n, b_p,
                      wb_n, wb_p, out_dim, adj_first):
            """One Conv layer (both N and P branches, all D dty-nets)."""

            def pre(d):
                x_n, x_p = xs_n[d], xs_p[d]
                if not inter:
                    if adj_first:
                        return (dot(dot(adj_n[d], x_n), w_n[d]),
                                dot(dot(adj_p[d], x_p), w_p[d]))
                    return (dot(adj_n[d], dot(x_n, w_n[d])),
                            dot(adj_p[d], dot(x_p, w_p[d])))
                if adj_first:
                    # adj_n[d] = [G_n ; H_n^T] (Nn+Np, Nn); adj_p[d] = [H_p^T ; G_p]
                    fn = dot(adj_n[d], x_n)               # [G_n@x_n ; H_n^T@x_n]
                    fp = dot(adj_p[d], x_p)               # [H_p^T@x_p ; G_p@x_p]
                    ff = jnp.concatenate([fn, fp], axis=1)      # (Nn+Np, 2*in)
                    # rows 0:Nn -> N branch, rows Nn: -> P branch;
                    # w_n[d] = [WnN ; WpN], w_p[d] = [WpP ; WnP] (row-stacked).
                    return (dot(ff[0:Nn, :], w_n[d]),
                            dot(ff[Nn:Nn + Np, :], w_p[d]))
                # weights-first: w_n[d] = [WnN | WpP], w_p[d] = [WpN | WnP]
                pn = dot(x_n, w_n[d])                     # (Nn, 2*out)
                pp = dot(x_p, w_p[d])                     # (Np, 2*out)
                cat_n = jnp.concatenate([pn[:, 0:out_dim], pp[:, 0:out_dim]], axis=0)
                cat_p = jnp.concatenate([pp[:, out_dim:2 * out_dim],
                                         pn[:, out_dim:2 * out_dim]], axis=0)
                # adj_n[d] = [G_n | H_p^T], adj_p[d] = [G_p | H_n^T]
                return dot(adj_n[d], cat_n), dot(adj_p[d], cat_p)

            out_n = [None] * D
            out_p = [None] * D
            p0n, p0p = pre(0)
            out_n[0] = jnp.maximum(p0n + b_n[0], 0.0)
            out_p[0] = jnp.maximum(p0p + b_p[0], 0.0)
            if use_intra:
                # base @ concat(WB[1:], axis=1): one dot, sliced per dty-net below.
                intra_n = dot(out_n[0], wb_n[...])        # (Nn, (D-1)*out_dim)
                intra_p = dot(out_p[0], wb_p[...])        # (Np, (D-1)*out_dim)
            for d in range(1, D):
                pdn, pdp = pre(d)
                if use_intra:
                    pdn = pdn + intra_n[:, (d - 1) * out_dim: d * out_dim]
                    pdp = pdp + intra_p[:, (d - 1) * out_dim: d * out_dim]
                out_n[d] = jnp.maximum(pdn + b_n[d], 0.0)
                out_p[d] = jnp.maximum(pdp + b_p[d], 0.0)
            return out_n, out_p

        XN = [xn_ref[d] for d in range(D)]
        XP = [xp_ref[d] for d in range(D)]

        # ---------------- Conv_1 ----------------
        x1n, x1p = run_layer(XN, XP, a1n, a1p, w1n, w1p, b1n, b1p,
                             wb1n, wb1p, h0, adj_first_1)

        # dropout_layer -> identity (eval semantics; see TODO at file top)

        # ---------------- Conv_2 ----------------
        x2n, x2p = run_layer(x1n, x1p, a2n, a2p, w2n, w2p, b2n, b2p,
                             wb2n, wb2p, h1, adj_first_2)

        # ------- Linear heads: lane-concat over dty nets + one wide dot each -------
        all_n = x2n[0] if D == 1 else jnp.concatenate(x2n, axis=1)   # (Nn, D*h1)
        all_p = x2p[0] if D == 1 else jnp.concatenate(x2p, axis=1)   # (Np, D*h1)
        on_ref[...] = dot(all_n, wln[...]) + bln[...]
        op_ref[...] = dot(all_p, wlp[...]) + blp[...]

    return kernel


# ----------------------------------------------------------------------------- #
# Wrapper: fuse/stack operands, call the kernel, concat the two outputs
# ----------------------------------------------------------------------------- #
def _layer_operands(branch_n, branch_p, Gn, Gp, HnT, HpT, inter, adj_first):
    """Build the fused adjacency / weight operands for one Conv layer."""
    if not inter:
        return Gn, Gp, branch_n["weight_n"], branch_p["weight_n"]
    if adj_first:
        # Reassociated: pre_N = (G_n@x_n)@WnN + (H_p^T@x_p)@WpN  (and P analogue).
        adj_n = jnp.concatenate([Gn, HnT], axis=1)                 # (D, Nn+Np, Nn)
        adj_p = jnp.concatenate([HpT, Gp], axis=1)                 # (D, Nn+Np, Np)
        w_n = jnp.concatenate([branch_n["weight_n"], branch_n["weight_p"]], axis=1)
        w_p = jnp.concatenate([branch_p["weight_p"], branch_p["weight_n"]], axis=1)
    else:
        # Original order: pre_N = G_n@(x_n@WnN) + H_p^T@(x_p@WpN)  (and P analogue).
        adj_n = jnp.concatenate([Gn, HpT], axis=2)                 # (D, Nn, Nn+Np)
        adj_p = jnp.concatenate([Gp, HnT], axis=2)                 # (D, Np, Np+Nn)
        w_n = jnp.concatenate([branch_n["weight_n"], branch_p["weight_p"]], axis=2)
        w_p = jnp.concatenate([branch_n["weight_p"], branch_p["weight_n"]], axis=2)
    return adj_n, adj_p, w_n, w_p


def npi_dgcn_pallas(params, X_n, X_p, G_n, G_p, H_n, H_p, dty_nets, inter, intra,
                    mxu_dtype=jnp.float32):
    """Run the whole NPI_DGCN forward as a single fused Pallas call."""
    assert "base" in dty_nets
    # Invariant: this ordering must match the torch.cat order over dty_nets.
    order = ["base"] + [d for d in dty_nets if d != "base"]
    D = len(order)
    Nn, in_ch = X_n["base"].shape
    Np = X_p["base"].shape[0]
    h0 = params["Conv_1"]["N"]["weight_n"].shape[2]
    h1 = params["Conv_2"]["N"]["weight_n"].shape[2]
    use_intra = bool(intra) and D > 1
    f32 = jnp.float32

    # Stack per-dty inputs along a leading D axis (fewer operands / DMAs).
    Xn = jnp.stack([X_n[d] for d in order]).astype(mxu_dtype)
    Xp = jnp.stack([X_p[d] for d in order]).astype(mxu_dtype)
    Gn = jnp.stack([G_n[d] for d in order]).astype(mxu_dtype)
    Gp = jnp.stack([G_p[d] for d in order]).astype(mxu_dtype)
    if inter:
        HnT = jnp.stack([H_n[d].T for d in order]).astype(mxu_dtype)   # (D, Np, Nn)
        HpT = jnp.stack([H_p[d].T for d in order]).astype(mxu_dtype)   # (D, Nn, Np)
    else:
        HnT = HpT = None

    # Per-layer matmul ordering from static shapes: contract the big NxN adjacency
    # against the smaller of (in_ft, out_ft).
    adj_first_1 = in_ch <= h0
    adj_first_2 = h0 <= h1

    c1n, c1p = params["Conv_1"]["N"], params["Conv_1"]["P"]
    c2n, c2p = params["Conv_2"]["N"], params["Conv_2"]["P"]
    a1n, a1p, w1n, w1p = _layer_operands(c1n, c1p, Gn, Gp, HnT, HpT, inter, adj_first_1)
    a2n, a2p, w2n, w2p = _layer_operands(c2n, c2p, Gn, Gp, HnT, HpT, inter, adj_first_2)

    def wb_cat(wb):   # (D, h, h) -> (h, (D-1)*h): all non-base WBs, one matmul RHS
        return jnp.concatenate([wb[d] for d in range(1, D)], axis=1)

    args = [Xn, Xp, a1n, a1p, w1n, w1p, c1n["bias"], c1p["bias"]]
    if use_intra:
        args += [wb_cat(c1n["WB"]), wb_cat(c1p["WB"])]
    args += [a2n, a2p, w2n, w2p, c2n["bias"], c2p["bias"]]
    if use_intra:
        args += [wb_cat(c2n["WB"]), wb_cat(c2p["WB"])]
    args += [params["Linear_n"]["weight"], params["Linear_n"]["bias"],
             params["Linear_p"]["weight"], params["Linear_p"]["bias"]]

    kernel = make_npi_dgcn_kernel(D, Nn, Np, h0, h1, bool(inter), use_intra,
                                  adj_first_1, adj_first_2, mxu_dtype)
    vmem = pl.BlockSpec(memory_space=pltpu.MemorySpace.VMEM)
    opt_n, opt_p = pl.pallas_call(
        kernel,
        in_specs=[vmem] * len(args),
        out_specs=[vmem, vmem],
        out_shape=(jax.ShapeDtypeStruct((Nn, h1), f32),
                   jax.ShapeDtypeStruct((Np, h1), f32)),
    )(*args)
    # Final torch.cat((opt_x_n, opt_x_p), 0) done in the wrapper (tile-aligned stores).
    return jnp.concatenate([opt_n, opt_p], axis=0)


# ----------------------------------------------------------------------------- #
# Parameter construction (deterministic; mirrors GraphConv.reset_parameters,
# with the D dty-nets of each (layer, branch) stacked on a leading axis)
# ----------------------------------------------------------------------------- #
def init_graphconv_branch(key, D, in_ft, out_ft):
    stdv = 1.0 / math.sqrt(out_ft)
    k1, k2, k3, k4 = jax.random.split(key, 4)
    return dict(
        weight_n=jax.random.uniform(k1, (D, in_ft, out_ft), jnp.float32, -stdv, stdv),
        weight_p=jax.random.uniform(k2, (D, in_ft, out_ft), jnp.float32, -stdv, stdv),
        bias=jax.random.uniform(k3, (D, 1, out_ft), jnp.float32, -stdv, stdv),
        WB=jax.random.uniform(k4, (D, out_ft, out_ft), jnp.float32, -stdv, stdv),
    )


def init_linear_params(key, in_ft, out_ft):
    stdv = 1.0 / math.sqrt(in_ft)
    k1, k2 = jax.random.split(key)
    # stored as (in, out) so the kernel does x @ W + b
    return dict(
        weight=jax.random.uniform(k1, (in_ft, out_ft), jnp.float32, -stdv, stdv),
        bias=jax.random.uniform(k2, (1, out_ft), jnp.float32, -stdv, stdv),
    )


def init_npi_dgcn_params(key, in_ch, n_hid, dty_nets):
    D = len(dty_nets)
    dims = {"Conv_1": (in_ch, n_hid[0]), "Conv_2": (n_hid[0], n_hid[1])}
    params = {}
    for li, layer in enumerate(("Conv_1", "Conv_2")):
        params[layer] = {}
        for bi, br in enumerate(("N", "P")):
            sub = jax.random.fold_in(key, li * 100 + bi * 10)
            params[layer][br] = init_graphconv_branch(sub, D, *dims[layer])
    params["Linear_n"] = init_linear_params(jax.random.fold_in(key, 1001),
                                            n_hid[-1] * D, n_hid[-1])
    params["Linear_p"] = init_linear_params(jax.random.fold_in(key, 1002),
                                            n_hid[-1] * D, n_hid[-1])
    return params


# ----------------------------------------------------------------------------- #
# Pure-JAX reference (mirrors the PyTorch module) for a correctness check
# ----------------------------------------------------------------------------- #
def npi_dgcn_reference(params, X_n, X_p, G_n, G_p, H_n, H_p, dty_nets, inter, intra):
    order = ["base"] + [d for d in dty_nets if d != "base"]

    def gconv_ref(p, d, XN, GN, XP, HP, B, _intra):
        X = GN @ (XN @ p["weight_n"][d])
        if inter:
            X = X + HP.T @ (XP @ p["weight_p"][d])
        if intra and _intra:
            X = X + B @ p["WB"][d]
        return jnp.maximum(X + p["bias"][d], 0.0)

    def conv_ref(lp, XN_d, XP_d):
        xu, xi = {}, {}
        xu["base"] = gconv_ref(lp["N"], 0, XN_d["base"], G_n["base"],
                               XP_d["base"], H_p["base"], None, False)
        xi["base"] = gconv_ref(lp["P"], 0, XP_d["base"], G_p["base"],
                               XN_d["base"], H_n["base"], None, False)
        for i, dty in enumerate(order[1:], start=1):
            xu[dty] = gconv_ref(lp["N"], i, XN_d[dty], G_n[dty],
                                XP_d[dty], H_p[dty], xu["base"], True)
            xi[dty] = gconv_ref(lp["P"], i, XP_d[dty], G_p[dty],
                                XN_d[dty], H_n[dty], xi["base"], True)
        return xu, xi

    x1n, x1p = conv_ref(params["Conv_1"], X_n, X_p)          # dropout -> identity
    x2n, x2p = conv_ref(params["Conv_2"], x1n, x1p)
    all_n = jnp.concatenate([x2n[d] for d in order], axis=1)
    all_p = jnp.concatenate([x2p[d] for d in order], axis=1)
    opt_n = all_n @ params["Linear_n"]["weight"] + params["Linear_n"]["bias"]
    opt_p = all_p @ params["Linear_p"]["weight"] + params["Linear_p"]["bias"]
    return jnp.concatenate([opt_n, opt_p], axis=0)


# ----------------------------------------------------------------------------- #
# Demo
# ----------------------------------------------------------------------------- #
if __name__ == "__main__":
    key = jax.random.PRNGKey(0)

    dty_nets = ("base", "net1", "net2")
    Nn, Np = 16, 8            # number of "n"-type / "p"-type nodes (8-aligned)
    in_ch = 16                # feature dim kept 8-aligned (perf: no padded tiles)
    n_hid = (32, 16)
    inter, intra = True, True

    params = init_npi_dgcn_params(jax.random.fold_in(key, 7), in_ch, n_hid, dty_nets)

    X_n, X_p, G_n, G_p, H_n, H_p = {}, {}, {}, {}, {}, {}
    for i, dty in enumerate(dty_nets):
        kk = jax.random.fold_in(key, 100 + i)
        k1, k2, k3, k4, k5, k6 = jax.random.split(kk, 6)
        X_n[dty] = jax.random.normal(k1, (Nn, in_ch), jnp.float32)
        X_p[dty] = jax.random.normal(k2, (Np, in_ch), jnp.float32)
        G_n[dty] = jax.random.normal(k3, (Nn, Nn), jnp.float32)   # n-n adjacency
        G_p[dty] = jax.random.normal(k4, (Np, Np), jnp.float32)   # p-p adjacency
        H_n[dty] = jax.random.normal(k5, (Nn, Np), jnp.float32)   # n-p incidence
        H_p[dty] = jax.random.normal(k6, (Np, Nn), jnp.float32)   # p-n incidence

    out = npi_dgcn_pallas(params, X_n, X_p, G_n, G_p, H_n, H_p,
                          dty_nets, inter, intra)
    out = jax.block_until_ready(out)

    assert out.shape == (Nn + Np, n_hid[-1]), out.shape
    assert jnp.all(jnp.isfinite(out))

    ref = npi_dgcn_reference(params, X_n, X_p, G_n, G_p, H_n, H_p,
                             dty_nets, inter, intra)
    ref = jax.block_until_ready(ref)
    assert jnp.allclose(out, ref, rtol=5e-2, atol=5e-2)

    print("KERNEL_OK")
</pallas_src>

<mosaic_0001>
module attributes {stable_mosaic.version = 11 : i64} {
  func.func @kernel(%arg0: memref<3x16x16xf32, #tpu.memory_space<vmem>>, %arg1: memref<3x8x16xf32, #tpu.memory_space<vmem>>, %arg2: memref<3x24x16xf32, #tpu.memory_space<vmem>>, %arg3: memref<3x24x8xf32, #tpu.memory_space<vmem>>, %arg4: memref<3x32x32xf32, #tpu.memory_space<vmem>>, %arg5: memref<3x32x32xf32, #tpu.memory_space<vmem>>, %arg6: memref<3x1x32xf32, #tpu.memory_space<vmem>>, %arg7: memref<3x1x32xf32, #tpu.memory_space<vmem>>, %arg8: memref<32x64xf32, #tpu.memory_space<vmem>>, %arg9: memref<32x64xf32, #tpu.memory_space<vmem>>, %arg10: memref<3x16x24xf32, #tpu.memory_space<vmem>>, %arg11: memref<3x8x24xf32, #tpu.memory_space<vmem>>, %arg12: memref<3x32x32xf32, #tpu.memory_space<vmem>>, %arg13: memref<3x32x32xf32, #tpu.memory_space<vmem>>, %arg14: memref<3x1x16xf32, #tpu.memory_space<vmem>>, %arg15: memref<3x1x16xf32, #tpu.memory_space<vmem>>, %arg16: memref<16x32xf32, #tpu.memory_space<vmem>>, %arg17: memref<16x32xf32, #tpu.memory_space<vmem>>, %arg18: memref<48x16xf32, #tpu.memory_space<vmem>>, %arg19: memref<1x16xf32, #tpu.memory_space<vmem>>, %arg20: memref<48x16xf32, #tpu.memory_space<vmem>>, %arg21: memref<1x16xf32, #tpu.memory_space<vmem>>, %arg22: memref<16x16xf32, #tpu.memory_space<vmem>>, %arg23: memref<8x16xf32, #tpu.memory_space<vmem>>) attributes {dimension_semantics = [], scalar_prefetch = 0 : i64, scratch_operands = 0 : i64, tpu.core_type = #tpu.core_type<tc>} {
    %c0 = arith.constant 0 : index
    %c0_0 = arith.constant 0 : index
    %c0_1 = arith.constant 0 : index
    %0 = vector.load %arg0[%c0, %c0_0, %c0_1] : memref<3x16x16xf32, #tpu.memory_space<vmem>>, vector<1x16x16xf32>
    %1 = vector.shape_cast %0 : vector<1x16x16xf32> to vector<16x16xf32>
    %c1 = arith.constant 1 : index
    %c0_2 = arith.constant 0 : index
    %c0_3 = arith.constant 0 : index
    %2 = vector.load %arg0[%c1, %c0_2, %c0_3] : memref<3x16x16xf32, #tpu.memory_space<vmem>>, vector<1x16x16xf32>
    %3 = vector.shape_cast %2 : vector<1x16x16xf32> to vector<16x16xf32>
    %c2 = arith.constant 2 : index
    %c0_4 = arith.constant 0 : index
    %c0_5 = arith.constant 0 : index
    %4 = vector.load %arg0[%c2, %c0_4, %c0_5] : memref<3x16x16xf32, #tpu.memory_space<vmem>>, vector<1x16x16xf32>
    %5 = vector.shape_cast %4 : vector<1x16x16xf32> to vector<16x16xf32>
    %c0_6 = arith.constant 0 : index
    %c0_7 = arith.constant 0 : index
    %c0_8 = arith.constant 0 : index
    %6 = vector.load %arg1[%c0_6, %c0_7, %c0_8] : memref<3x8x16xf32, #tpu.memory_space<vmem>>, vector<1x8x16xf32>
    %7 = vector.shape_cast %6 : vector<1x8x16xf32> to vector<8x16xf32>
    %c1_9 = arith.constant 1 : index
    %c0_10 = arith.constant 0 : index
    %c0_11 = arith.constant 0 : index
    %8 = vector.load %arg1[%c1_9, %c0_10, %c0_11] : memref<3x8x16xf32, #tpu.memory_space<vmem>>, vector<1x8x16xf32>
    %9 = vector.shape_cast %8 : vector<1x8x16xf32> to vector<8x16xf32>
    %c2_12 = arith.constant 2 : index
    %c0_13 = arith.constant 0 : index
    %c0_14 = arith.constant 0 : index
    %10 = vector.load %arg1[%c2_12, %c0_13, %c0_14] : memref<3x8x16xf32, #tpu.memory_space<vmem>>, vector<1x8x16xf32>
    %11 = vector.shape_cast %10 : vector<1x8x16xf32> to vector<8x16xf32>
    %c0_15 = arith.constant 0 : index
    %c0_16 = arith.constant 0 : index
    %c0_17 = arith.constant 0 : index
    %12 = vector.load %arg2[%c0_15, %c0_16, %c0_17] : memref<3x24x16xf32, #tpu.memory_space<vmem>>, vector<1x24x16xf32>
    %13 = vector.shape_cast %12 : vector<1x24x16xf32> to vector<24x16xf32>
    %cst = arith.constant dense<0.000000e+00> : vector<24x16xf32>
    %14 = tpu.matmul %13, %1, %cst {dimension_numbers = #tpu.dot_dimension_numbers<[1], [0], [0], [1], [0, 0, 1, 1], [], []>} : vector<24x16xf32>, vector<16x16xf32>, vector<24x16xf32> -> vector<24x16xf32>
    %c0_18 = arith.constant 0 : index
    %c0_19 = arith.constant 0 : index
    %c0_20 = arith.constant 0 : index
    %15 = vector.load %arg3[%c0_18, %c0_19, %c0_20] : memref<3x24x8xf32, #tpu.memory_space<vmem>>, vector<1x24x8xf32>
    %16 = vector.shape_cast %15 : vector<1x24x8xf32> to vector<24x8xf32>
    %cst_21 = arith.constant dense<0.000000e+00> : vector<24x16xf32>
    %17 = tpu.matmul %16, %7, %cst_21 {dimension_numbers = #tpu.dot_dimension_numbers<[1], [0], [0], [1], [0, 0, 1, 1], [], []>} : vector<24x8xf32>, vector<8x16xf32>, vector<24x16xf32> -> vector<24x16xf32>
    %18 = tpu.concatenate %14, %17 in 1 : vector<24x16xf32>, vector<24x16xf32> -> vector<24x32xf32>
    %19 = vector.extract_strided_slice %18 {offsets = [0, 0], sizes = [16, 32], strides = [1, 1]} : vector<24x32xf32> to vector<16x32xf32>
    %c0_22 = arith.constant 0 : index
    %c0_23 = arith.constant 0 : index
    %c0_24 = arith.constant 0 : index
    %20 = vector.load %arg4[%c0_22, %c0_23, %c0_24] : memref<3x32x32xf32, #tpu.memory_space<vmem>>, vector<1x32x32xf32>
    %21 = vector.shape_cast %20 : vector<1x32x32xf32> to vector<32x32xf32>
    %cst_25 = arith.constant dense<0.000000e+00> : vector<16x32xf32>
    %22 = tpu.matmul %19, %21, %cst_25 {dimension_numbers = #tpu.dot_dimension_numbers<[1], [0], [0], [1], [0, 0, 1, 1], [], []>} : vector<16x32xf32>, vector<32x32xf32>, vector<16x32xf32> -> vector<16x32xf32>
    %23 = vector.extract_strided_slice %18 {offsets = [16, 0], sizes = [8, 32], strides = [1, 1]} : vector<24x32xf32> to vector<8x32xf32>
    %c0_26 = arith.constant 0 : index
    %c0_27 = arith.constant 0 : index
    %c0_28 = arith.constant 0 : index
    %24 = vector.load %arg5[%c0_26, %c0_27, %c0_28] : memref<3x32x32xf32, #tpu.memory_space<vmem>>, vector<1x32x32xf32>
    %25 = vector.shape_cast %24 : vector<1x32x32xf32> to vector<32x32xf32>
    %cst_29 = arith.constant dense<0.000000e+00> : vector<8x32xf32>
    %26 = tpu.matmul %23, %25, %cst_29 {dimension_numbers = #tpu.dot_dimension_numbers<[1], [0], [0], [1], [0, 0, 1, 1], [], []>} : vector<8x32xf32>, vector<32x32xf32>, vector<8x32xf32> -> vector<8x32xf32>
    %c0_30 = arith.constant 0 : index
    %c0_31 = arith.constant 0 : index
    %c0_32 = arith.constant 0 : index
    %27 = vector.load %arg6[%c0_30, %c0_31, %c0_32] : memref<3x1x32xf32, #tpu.memory_space<vmem>>, vector<1x1x32xf32>
    %28 = vector.shape_cast %27 : vector<1x1x32xf32> to vector<1x32xf32>
    %29 = vector.broadcast %28 : vector<1x32xf32> to vector<16x32xf32>
    %30 = arith.addf %22, %29 : vector<16x32xf32>
    %cst_33 = arith.constant 0.000000e+00 : f32
    %31 = vector.broadcast %cst_33 : f32 to vector<16x32xf32>
    %32 = arith.maximumf %30, %31 : vector<16x32xf32>
    %c0_34 = arith.constant 0 : index
    %c0_35 = arith.constant 0 : index
    %c0_36 = arith.constant 0 : index
    %33 = vector.load %arg7[%c0_34, %c0_35, %c0_36] : memref<3x1x32xf32, #tpu.memory_space<vmem>>, vector<1x1x32xf32>
    %34 = vector.shape_cast %33 : vector<1x1x32xf32> to vector<1x32xf32>
    %35 = vector.broadcast %34 : vector<1x32xf32> to vector<8x32xf32>
    %36 = arith.addf %26, %35 : vector<8x32xf32>
    %cst_37 = arith.constant 0.000000e+00 : f32
    %37 = vector.broadcast %cst_37 : f32 to vector<8x32xf32>
    %38 = arith.maximumf %36, %37 : vector<8x32xf32>
    %c0_38 = arith.constant 0 : index
    %c0_39 = arith.constant 0 : index
    %39 = vector.load %arg8[%c0_38, %c0_39] : memref<32x64xf32, #tpu.memory_space<vmem>>, vector<32x64xf32>
    %cst_40 = arith.constant dense<0.000000e+00> : vector<16x64xf32>
    %40 = tpu.matmul %32, %39, %cst_40 {dimension_numbers = #tpu.dot_dimension_numbers<[1], [0], [0], [1], [0, 0, 1, 1], [], []>} : vector<16x32xf32>, vector<32x64xf32>, vector<16x64xf32> -> vector<16x64xf32>
    %c0_41 = arith.constant 0 : index
    %c0_42 = arith.constant 0 : index
    %41 = vector.load %arg9[%c0_41, %c0_42] : memref<32x64xf32, #tpu.memory_space<vmem>>, vector<32x64xf32>
    %cst_43 = arith.constant dense<0.000000e+00> : vector<8x64xf32>
    %42 = tpu.matmul %38, %41, %cst_43 {dimension_numbers = #tpu.dot_dimension_numbers<[1], [0], [0], [1], [0, 0, 1, 1], [], []>} : vector<8x32xf32>, vector<32x64xf32>, vector<8x64xf32> -> vector<8x64xf32>
    %c1_44 = arith.constant 1 : index
    %c0_45 = arith.constant 0 : index
    %c0_46 = arith.constant 0 : index
    %43 = vector.load %arg2[%c1_44, %c0_45, %c0_46] : memref<3x24x16xf32, #tpu.memory_space<vmem>>, vector<1x24x16xf32>
    %44 = vector.shape_cast %43 : vector<1x24x16xf32> to vector<24x16xf32>
    %cst_47 = arith.constant dense<0.000000e+00> : vector<24x16xf32>
    %45 = tpu.matmul %44, %3, %cst_47 {dimension_numbers = #tpu.dot_dimension_numbers<[1], [0], [0], [1], [0, 0, 1, 1], [], []>} : vector<24x16xf32>, vector<16x16xf32>, vector<24x16xf32> -> vector<24x16xf32>
    %c1_48 = arith.constant 1 : index
    %c0_49 = arith.constant 0 : index
    %c0_50 = arith.constant 0 : index
    %46 = vector.load %arg3[%c1_48, %c0_49, %c0_50] : memref<3x24x8xf32, #tpu.memory_space<vmem>>, vector<1x24x8xf32>
    %47 = vector.shape_cast %46 : vector<1x24x8xf32> to vector<24x8xf32>
    %cst_51 = arith.constant dense<0.000000e+00> : vector<24x16xf32>
    %48 = tpu.matmul %47, %9, %cst_51 {dimension_numbers = #tpu.dot_dimension_numbers<[1], [0], [0], [1], [0, 0, 1, 1], [], []>} : vector<24x8xf32>, vector<8x16xf32>, vector<24x16xf32> -> vector<24x16xf32>
    %49 = tpu.concatenate %45, %48 in 1 : vector<24x16xf32>, vector<24x16xf32> -> vector<24x32xf32>
    %50 = vector.extract_strided_slice %49 {offsets = [0, 0], sizes = [16, 32], strides = [1, 1]} : vector<24x32xf32> to vector<16x32xf32>
    %c1_52 = arith.constant 1 : index
    %c0_53 = arith.constant 0 : index
    %c0_54 = arith.constant 0 : index
    %51 = vector.load %arg4[%c1_52, %c0_53, %c0_54] : memref<3x32x32xf32, #tpu.memory_space<vmem>>, vector<1x32x32xf32>
    %52 = vector.shape_cast %51 : vector<1x32x32xf32> to vector<32x32xf32>
    %cst_55 = arith.constant dense<0.000000e+00> : vector<16x32xf32>
    %53 = tpu.matmul %50, %52, %cst_55 {dimension_numbers = #tpu.dot_dimension_numbers<[1], [0], [0], [1], [0, 0, 1, 1], [], []>} : vector<16x32xf32>, vector<32x32xf32>, vector<16x32xf32> -> vector<16x32xf32>
    %54 = vector.extract_strided_slice %49 {offsets = [16, 0], sizes = [8, 32], strides = [1, 1]} : vector<24x32xf32> to vector<8x32xf32>
    %c1_56 = arith.constant 1 : index
    %c0_57 = arith.constant 0 : index
    %c0_58 = arith.constant 0 : index
    %55 = vector.load %arg5[%c1_56, %c0_57, %c0_58] : memref<3x32x32xf32, #tpu.memory_space<vmem>>, vector<1x32x32xf32>
    %56 = vector.shape_cast %55 : vector<1x32x32xf32> to vector<32x32xf32>
    %cst_59 = arith.constant dense<0.000000e+00> : vector<8x32xf32>
    %57 = tpu.matmul %54, %56, %cst_59 {dimension_numbers = #tpu.dot_dimension_numbers<[1], [0], [0], [1], [0, 0, 1, 1], [], []>} : vector<8x32xf32>, vector<32x32xf32>, vector<8x32xf32> -> vector<8x32xf32>
    %58 = vector.extract_strided_slice %40 {offsets = [0, 0], sizes = [16, 32], strides = [1, 1]} : vector<16x64xf32> to vector<16x32xf32>
    %59 = arith.addf %53, %58 : vector<16x32xf32>
    %60 = vector.extract_strided_slice %42 {offsets = [0, 0], sizes = [8, 32], strides = [1, 1]} : vector<8x64xf32> to vector<8x32xf32>
    %61 = arith.addf %57, %60 : vector<8x32xf32>
    %c1_60 = arith.constant 1 : index
    %c0_61 = arith.constant 0 : index
    %c0_62 = arith.constant 0 : index
    %62 = vector.load %arg6[%c1_60, %c0_61, %c0_62] : memref<3x1x32xf32, #tpu.memory_space<vmem>>, vector<1x1x32xf32>
    %63 = vector.shape_cast %62 : vector<1x1x32xf32> to vector<1x32xf32>
    %64 = vector.broadcast %63 : vector<1x32xf32> to vector<16x32xf32>
    %65 = arith.addf %59, %64 : vector<16x32xf32>
    %cst_63 = arith.constant 0.000000e+00 : f32
    %66 = vector.broadcast %cst_63 : f32 to vector<16x32xf32>
    %67 = arith.maximumf %65, %66 : vector<16x32xf32>
    %c1_64 = arith.constant 1 : index
    %c0_65 = arith.constant 0 : index
    %c0_66 = arith.constant 0 : index
    %68 = vector.load %arg7[%c1_64, %c0_65, %c0_66] : memref<3x1x32xf32, #tpu.memory_space<vmem>>, vector<1x1x32xf32>
    %69 = vector.shape_cast %68 : vector<1x1x32xf32> to vector<1x32xf32>
    %70 = vector.broadcast %69 : vector<1x32xf32> to vector<8x32xf32>
    %71 = arith.addf %61, %70 : vector<8x32xf32>
    %cst_67 = arith.constant 0.000000e+00 : f32
    %72 = vector.broadcast %cst_67 : f32 to vector<8x32xf32>
    %73 = arith.maximumf %71, %72 : vector<8x32xf32>
    %c2_68 = arith.constant 2 : index
    %c0_69 = arith.constant 0 : index
    %c0_70 = arith.constant 0 : index
    %74 = vector.load %arg2[%c2_68, %c0_69, %c0_70] : memref<3x24x16xf32, #tpu.memory_space<vmem>>, vector<1x24x16xf32>
    %75 = vector.shape_cast %74 : vector<1x24x16xf32> to vector<24x16xf32>
    %cst_71 = arith.constant dense<0.000000e+00> : vector<24x16xf32>
    %76 = tpu.matmul %75, %5, %cst_71 {dimension_numbers = #tpu.dot_dimension_numbers<[1], [0], [0], [1], [0, 0, 1, 1], [], []>} : vector<24x16xf32>, vector<16x16xf32>, vector<24x16xf32> -> vector<24x16xf32>
    %c2_72 = arith.constant 2 : index
    %c0_73 = arith.constant 0 : index
    %c0_74 = arith.constant 0 : index
    %77 = vector.load %arg3[%c2_72, %c0_73, %c0_74] : memref<3x24x8xf32, #tpu.memory_space<vmem>>, vector<1x24x8xf32>
    %78 = vector.shape_cast %77 : vector<1x24x8xf32> to vector<24x8xf32>
    %cst_75 = arith.constant dense<0.000000e+00> : vector<24x16xf32>
    %79 = tpu.matmul %78, %11, %cst_75 {dimension_numbers = #tpu.dot_dimension_numbers<[1], [0], [0], [1], [0, 0, 1, 1], [], []>} : vector<24x8xf32>, vector<8x16xf32>, vector<24x16xf32> -> vector<24x16xf32>
    %80 = tpu.concatenate %76, %79 in 1 : vector<24x16xf32>, vector<24x16xf32> -> vector<24x32xf32>
    %81 = vector.extract_strided_slice %80 {offsets = [0, 0], sizes = [16, 32], strides = [1, 1]} : vector<24x32xf32> to vector<16x32xf32>
    %c2_76 = arith.constant 2 : index
    %c0_77 = arith.constant 0 : index
    %c0_78 = arith.constant 0 : index
    %82 = vector.load %arg4[%c2_76, %c0_77, %c0_78] : memref<3x32x32xf32, #tpu.memory_space<vmem>>, vector<1x32x32xf32>
    %83 = vector.shape_cast %82 : vector<1x32x32xf32> to vector<32x32xf32>
    %cst_79 = arith.constant dense<0.000000e+00> : vector<16x32xf32>
    %84 = tpu.matmul %81, %83, %cst_79 {dimension_numbers = #tpu.dot_dimension_numbers<[1], [0], [0], [1], [0, 0, 1, 1], [], []>} : vector<16x32xf32>, vector<32x32xf32>, vector<16x32xf32> -> vector<16x32xf32>
    %85 = vector.extract_strided_slice %80 {offsets = [16, 0], sizes = [8, 32], strides = [1, 1]} : vector<24x32xf32> to vector<8x32xf32>
    %c2_80 = arith.constant 2 : index
    %c0_81 = arith.constant 0 : index
    %c0_82 = arith.constant 0 : index
    %86 = vector.load %arg5[%c2_80, %c0_81, %c0_82] : memref<3x32x32xf32, #tpu.memory_space<vmem>>, vector<1x32x32xf32>
    %87 = vector.shape_cast %86 : vector<1x32x32xf32> to vector<32x32xf32>
    %cst_83 = arith.constant dense<0.000000e+00> : vector<8x32xf32>
    %88 = tpu.matmul %85, %87, %cst_83 {dimension_numbers = #tpu.dot_dimension_numbers<[1], [0], [0], [1], [0, 0, 1, 1], [], []>} : vector<8x32xf32>, vector<32x32xf32>, vector<8x32xf32> -> vector<8x32xf32>
    %89 = vector.extract_strided_slice %40 {offsets = [0, 32], sizes = [16, 32], strides = [1, 1]} : vector<16x64xf32> to vector<16x32xf32>
    %90 = arith.addf %84, %89 : vector<16x32xf32>
    %91 = vector.extract_strided_slice %42 {offsets = [0, 32], sizes = [8, 32], strides = [1, 1]} : vector<8x64xf32> to vector<8x32xf32>
    %92 = arith.addf %88, %91 : vector<8x32xf32>
    %c2_84 = arith.constant 2 : index
    %c0_85 = arith.constant 0 : index
    %c0_86 = arith.constant 0 : index
    %93 = vector.load %arg6[%c2_84, %c0_85, %c0_86] : memref<3x1x32xf32, #tpu.memory_space<vmem>>, vector<1x1x32xf32>
    %94 = vector.shape_cast %93 : vector<1x1x32xf32> to vector<1x32xf32>
    %95 = vector.broadcast %94 : vector<1x32xf32> to vector<16x32xf32>
    %96 = arith.addf %90, %95 : vector<16x32xf32>
    %cst_87 = arith.constant 0.000000e+00 : f32
    %97 = vector.broadcast %cst_87 : f32 to vector<16x32xf32>
    %98 = arith.maximumf %96, %97 : vector<16x32xf32>
    %c2_88 = arith.constant 2 : index
    %c0_89 = arith.constant 0 : index
    %c0_90 = arith.constant 0 : index
    %99 = vector.load %arg7[%c2_88, %c0_89, %c0_90] : memref<3x1x32xf32, #tpu.memory_space<vmem>>, vector<1x1x32xf32>
    %100 = vector.shape_cast %99 : vector<1x1x32xf32> to vector<1x32xf32>
    %101 = vector.broadcast %100 : vector<1x32xf32> to vector<8x32xf32>
    %102 = arith.addf %92, %101 : vector<8x32xf32>
    %cst_91 = arith.constant 0.000000e+00 : f32
    %103 = vector.broadcast %cst_91 : f32 to vector<8x32xf32>
    %104 = arith.maximumf %102, %103 : vector<8x32xf32>
    %c0_92 = arith.constant 0 : index
    %c0_93 = arith.constant 0 : index
    %c0_94 = arith.constant 0 : index
    %105 = vector.load %arg12[%c0_92, %c0_93, %c0_94] : memref<3x32x32xf32, #tpu.memory_space<vmem>>, vector<1x32x32xf32>
    %106 = vector.shape_cast %105 : vector<1x32x32xf32> to vector<32x32xf32>
    %cst_95 = arith.constant dense<0.000000e+00> : vector<16x32xf32>
    %107 = tpu.matmul %32, %106, %cst_95 {dimension_numbers = #tpu.dot_dimension_numbers<[1], [0], [0], [1], [0, 0, 1, 1], [], []>} : vector<16x32xf32>, vector<32x32xf32>, vector<16x32xf32> -> vector<16x32xf32>
    %c0_96 = arith.constant 0 : index
    %c0_97 = arith.constant 0 : index
    %c0_98 = arith.constant 0 : index
    %108 = vector.load %arg13[%c0_96, %c0_97, %c0_98] : memref<3x32x32xf32, #tpu.memory_space<vmem>>, vector<1x32x32xf32>
    %109 = vector.shape_cast %108 : vector<1x32x32xf32> to vector<32x32xf32>
    %cst_99 = arith.constant dense<0.000000e+00> : vector<8x32xf32>
    %110 = tpu.matmul %38, %109, %cst_99 {dimension_numbers = #tpu.dot_dimension_numbers<[1], [0], [0], [1], [0, 0, 1, 1], [], []>} : vector<8x32xf32>, vector<32x32xf32>, vector<8x32xf32> -> vector<8x32xf32>
    %111 = vector.extract_strided_slice %107 {offsets = [0, 0], sizes = [16, 16], strides = [1, 1]} : vector<16x32xf32> to vector<16x16xf32>
    %112 = vector.extract_strided_slice %110 {offsets = [0, 0], sizes = [8, 16], strides = [1, 1]} : vector<8x32xf32> to vector<8x16xf32>
    %113 = tpu.concatenate %111, %112 in 0 : vector<16x16xf32>, vector<8x16xf32> -> vector<24x16xf32>
    %114 = vector.extract_strided_slice %110 {offsets = [0, 16], sizes = [8, 16], strides = [1, 1]} : vector<8x32xf32> to vector<8x16xf32>
    %115 = vector.extract_strided_slice %107 {offsets = [0, 16], sizes = [16, 16], strides = [1, 1]} : vector<16x32xf32> to vector<16x16xf32>
    %116 = tpu.concatenate %114, %115 in 0 : vector<8x16xf32>, vector<16x16xf32> -> vector<24x16xf32>
    %c0_100 = arith.constant 0 : index
    %c0_101 = arith.constant 0 : index
    %c0_102 = arith.constant 0 : index
    %117 = vector.load %arg10[%c0_100, %c0_101, %c0_102] : memref<3x16x24xf32, #tpu.memory_space<vmem>>, vector<1x16x24xf32>
    %118 = vector.shape_cast %117 : vector<1x16x24xf32> to vector<16x24xf32>
    %cst_103 = arith.constant dense<0.000000e+00> : vector<16x16xf32>
    %119 = tpu.matmul %118, %113, %cst_103 {dimension_numbers = #tpu.dot_dimension_numbers<[1], [0], [0], [1], [0, 0, 1, 1], [], []>} : vector<16x24xf32>, vector<24x16xf32>, vector<16x16xf32> -> vector<16x16xf32>
    %c0_104 = arith.constant 0 : index
    %c0_105 = arith.constant 0 : index
    %c0_106 = arith.constant 0 : index
    %120 = vector.load %arg11[%c0_104, %c0_105, %c0_106] : memref<3x8x24xf32, #tpu.memory_space<vmem>>, vector<1x8x24xf32>
    %121 = vector.shape_cast %120 : vector<1x8x24xf32> to vector<8x24xf32>
    %cst_107 = arith.constant dense<0.000000e+00> : vector<8x16xf32>
    %122 = tpu.matmul %121, %116, %cst_107 {dimension_numbers = #tpu.dot_dimension_numbers<[1], [0], [0], [1], [0, 0, 1, 1], [], []>} : vector<8x24xf32>, vector<24x16xf32>, vector<8x16xf32> -> vector<8x16xf32>
    %c0_108 = arith.constant 0 : index
    %c0_109 = arith.constant 0 : index
    %c0_110 = arith.constant 0 : index
    %123 = vector.load %arg14[%c0_108, %c0_109, %c0_110] : memref<3x1x16xf32, #tpu.memory_space<vmem>>, vector<1x1x16xf32>
    %124 = vector.shape_cast %123 : vector<1x1x16xf32> to vector<1x16xf32>
    %125 = vector.broadcast %124 : vector<1x16xf32> to vector<16x16xf32>
    %126 = arith.addf %119, %125 : vector<16x16xf32>
    %cst_111 = arith.constant 0.000000e+00 : f32
    %127 = vector.broadcast %cst_111 : f32 to vector<16x16xf32>
    %128 = arith.maximumf %126, %127 : vector<16x16xf32>
    %c0_112 = arith.constant 0 : index
    %c0_113 = arith.constant 0 : index
    %c0_114 = arith.constant 0 : index
    %129 = vector.load %arg15[%c0_112, %c0_113, %c0_114] : memref<3x1x16xf32, #tpu.memory_space<vmem>>, vector<1x1x16xf32>
    %130 = vector.shape_cast %129 : vector<1x1x16xf32> to vector<1x16xf32>
    %131 = vector.broadcast %130 : vector<1x16xf32> to vector<8x16xf32>
    %132 = arith.addf %122, %131 : vector<8x16xf32>
    %cst_115 = arith.constant 0.000000e+00 : f32
    %133 = vector.broadcast %cst_115 : f32 to vector<8x16xf32>
    %134 = arith.maximumf %132, %133 : vector<8x16xf32>
    %c0_116 = arith.constant 0 : index
    %c0_117 = arith.constant 0 : index
    %135 = vector.load %arg16[%c0_116, %c0_117] : memref<16x32xf32, #tpu.memory_space<vmem>>, vector<16x32xf32>
    %cst_118 = arith.constant dense<0.000000e+00> : vector<16x32xf32>
    %136 = tpu.matmul %128, %135, %cst_118 {dimension_numbers = #tpu.dot_dimension_numbers<[1], [0], [0], [1], [0, 0, 1, 1], [], []>} : vector<16x16xf32>, vector<16x32xf32>, vector<16x32xf32> -> vector<16x32xf32>
    %c0_119 = arith.constant 0 : index
    %c0_120 = arith.constant 0 : index
    %137 = vector.load %arg17[%c0_119, %c0_120] : memref<16x32xf32, #tpu.memory_space<vmem>>, vector<16x32xf32>
    %cst_121 = arith.constant dense<0.000000e+00> : vector<8x32xf32>
    %138 = tpu.matmul %134, %137, %cst_121 {dimension_numbers = #tpu.dot_dimension_numbers<[1], [0], [0], [1], [0, 0, 1, 1], [], []>} : vector<8x16xf32>, vector<16x32xf32>, vector<8x32xf32> -> vector<8x32xf32>
    %c1_122 = arith.constant 1 : index
    %c0_123 = arith.constant 0 : index
    %c0_124 = arith.constant 0 : index
    %139 = vector.load %arg12[%c1_122, %c0_123, %c0_124] : memref<3x32x32xf32, #tpu.memory_space<vmem>>, vector<1x32x32xf32>
    %140 = vector.shape_cast %139 : vector<1x32x32xf32> to vector<32x32xf32>
    %cst_125 = arith.constant dense<0.000000e+00> : vector<16x32xf32>
    %141 = tpu.matmul %67, %140, %cst_125 {dimension_numbers = #tpu.dot_dimension_numbers<[1], [0], [0], [1], [0, 0, 1, 1], [], []>} : vector<16x32xf32>, vector<32x32xf32>, vector<16x32xf32> -> vector<16x32xf32>
    %c1_126 = arith.constant 1 : index
    %c0_127 = arith.constant 0 : index
    %c0_128 = arith.constant 0 : index
    %142 = vector.load %arg13[%c1_126, %c0_127, %c0_128] : memref<3x32x32xf32, #tpu.memory_space<vmem>>, vector<1x32x32xf32>
    %143 = vector.shape_cast %142 : vector<1x32x32xf32> to vector<32x32xf32>
    %cst_129 = arith.constant dense<0.000000e+00> : vector<8x32xf32>
    %144 = tpu.matmul %73, %143, %cst_129 {dimension_numbers = #tpu.dot_dimension_numbers<[1], [0], [0], [1], [0, 0, 1, 1], [], []>} : vector<8x32xf32>, vector<32x32xf32>, vector<8x32xf32> -> vector<8x32xf32>
    %145 = vector.extract_strided_slice %141 {offsets = [0, 0], sizes = [16, 16], strides = [1, 1]} : vector<16x32xf32> to vector<16x16xf32>
    %146 = vector.extract_strided_slice %144 {offsets = [0, 0], sizes = [8, 16], strides = [1, 1]} : vector<8x32xf32> to vector<8x16xf32>
    %147 = tpu.concatenate %145, %146 in 0 : vector<16x16xf32>, vector<8x16xf32> -> vector<24x16xf32>
    %148 = vector.extract_strided_slice %144 {offsets = [0, 16], sizes = [8, 16], strides = [1, 1]} : vector<8x32xf32> to vector<8x16xf32>
    %149 = vector.extract_strided_slice %141 {offsets = [0, 16], sizes = [16, 16], strides = [1, 1]} : vector<16x32xf32> to vector<16x16xf32>
    %150 = tpu.concatenate %148, %149 in 0 : vector<8x16xf32>, vector<16x16xf32> -> vector<24x16xf32>
    %c1_130 = arith.constant 1 : index
    %c0_131 = arith.constant 0 : index
    %c0_132 = arith.constant 0 : index
    %151 = vector.load %arg10[%c1_130, %c0_131, %c0_132] : memref<3x16x24xf32, #tpu.memory_space<vmem>>, vector<1x16x24xf32>
    %152 = vector.shape_cast %151 : vector<1x16x24xf32> to vector<16x24xf32>
    %cst_133 = arith.constant dense<0.000000e+00> : vector<16x16xf32>
    %153 = tpu.matmul %152, %147, %cst_133 {dimension_numbers = #tpu.dot_dimension_numbers<[1], [0], [0], [1], [0, 0, 1, 1], [], []>} : vector<16x24xf32>, vector<24x16xf32>, vector<16x16xf32> -> vector<16x16xf32>
    %c1_134 = arith.constant 1 : index
    %c0_135 = arith.constant 0 : index
    %c0_136 = arith.constant 0 : index
    %154 = vector.load %arg11[%c1_134, %c0_135, %c0_136] : memref<3x8x24xf32, #tpu.memory_space<vmem>>, vector<1x8x24xf32>
    %155 = vector.shape_cast %154 : vector<1x8x24xf32> to vector<8x24xf32>
    %cst_137 = arith.constant dense<0.000000e+00> : vector<8x16xf32>
    %156 = tpu.matmul %155, %150, %cst_137 {dimension_numbers = #tpu.dot_dimension_numbers<[1], [0], [0], [1], [0, 0, 1, 1], [], []>} : vector<8x24xf32>, vector<24x16xf32>, vector<8x16xf32> -> vector<8x16xf32>
    %157 = vector.extract_strided_slice %136 {offsets = [0, 0], sizes = [16, 16], strides = [1, 1]} : vector<16x32xf32> to vector<16x16xf32>
    %158 = arith.addf %153, %157 : vector<16x16xf32>
    %159 = vector.extract_strided_slice %138 {offsets = [0, 0], sizes = [8, 16], strides = [1, 1]} : vector<8x32xf32> to vector<8x16xf32>
    %160 = arith.addf %156, %159 : vector<8x16xf32>
    %c1_138 = arith.constant 1 : index
    %c0_139 = arith.constant 0 : index
    %c0_140 = arith.constant 0 : index
    %161 = vector.load %arg14[%c1_138, %c0_139, %c0_140] : memref<3x1x16xf32, #tpu.memory_space<vmem>>, vector<1x1x16xf32>
    %162 = vector.shape_cast %161 : vector<1x1x16xf32> to vector<1x16xf32>
    %163 = vector.broadcast %162 : vector<1x16xf32> to vector<16x16xf32>
    %164 = arith.addf %158, %163 : vector<16x16xf32>
    %cst_141 = arith.constant 0.000000e+00 : f32
    %165 = vector.broadcast %cst_141 : f32 to vector<16x16xf32>
    %166 = arith.maximumf %164, %165 : vector<16x16xf32>
    %c1_142 = arith.constant 1 : index
    %c0_143 = arith.constant 0 : index
    %c0_144 = arith.constant 0 : index
    %167 = vector.load %arg15[%c1_142, %c0_143, %c0_144] : memref<3x1x16xf32, #tpu.memory_space<vmem>>, vector<1x1x16xf32>
    %168 = vector.shape_cast %167 : vector<1x1x16xf32> to vector<1x16xf32>
    %169 = vector.broadcast %168 : vector<1x16xf32> to vector<8x16xf32>
    %170 = arith.addf %160, %169 : vector<8x16xf32>
    %cst_145 = arith.constant 0.000000e+00 : f32
    %171 = vector.broadcast %cst_145 : f32 to vector<8x16xf32>
    %172 = arith.maximumf %170, %171 : vector<8x16xf32>
    %c2_146 = arith.constant 2 : index
    %c0_147 = arith.constant 0 : index
    %c0_148 = arith.constant 0 : index
    %173 = vector.load %arg12[%c2_146, %c0_147, %c0_148] : memref<3x32x32xf32, #tpu.memory_space<vmem>>, vector<1x32x32xf32>
    %174 = vector.shape_cast %173 : vector<1x32x32xf32> to vector<32x32xf32>
    %cst_149 = arith.constant dense<0.000000e+00> : vector<16x32xf32>
    %175 = tpu.matmul %98, %174, %cst_149 {dimension_numbers = #tpu.dot_dimension_numbers<[1], [0], [0], [1], [0, 0, 1, 1], [], []>} : vector<16x32xf32>, vector<32x32xf32>, vector<16x32xf32> -> vector<16x32xf32>
    %c2_150 = arith.constant 2 : index
    %c0_151 = arith.constant 0 : index
    %c0_152 = arith.constant 0 : index
    %176 = vector.load %arg13[%c2_150, %c0_151, %c0_152] : memref<3x32x32xf32, #tpu.memory_space<vmem>>, vector<1x32x32xf32>
    %177 = vector.shape_cast %176 : vector<1x32x32xf32> to vector<32x32xf32>
    %cst_153 = arith.constant dense<0.000000e+00> : vector<8x32xf32>
    %178 = tpu.matmul %104, %177, %cst_153 {dimension_numbers = #tpu.dot_dimension_numbers<[1], [0], [0], [1], [0, 0, 1, 1], [], []>} : vector<8x32xf32>, vector<32x32xf32>, vector<8x32xf32> -> vector<8x32xf32>
    %179 = vector.extract_strided_slice %175 {offsets = [0, 0], sizes = [16, 16], strides = [1, 1]} : vector<16x32xf32> to vector<16x16xf32>
    %180 = vector.extract_strided_slice %178 {offsets = [0, 0], sizes = [8, 16], strides = [1, 1]} : vector<8x32xf32> to vector<8x16xf32>
    %181 = tpu.concatenate %179, %180 in 0 : vector<16x16xf32>, vector<8x16xf32> -> vector<24x16xf32>
    %182 = vector.extract_strided_slice %178 {offsets = [0, 16], sizes = [8, 16], strides = [1, 1]} : vector<8x32xf32> to vector<8x16xf32>
    %183 = vector.extract_strided_slice %175 {offsets = [0, 16], sizes = [16, 16], strides = [1, 1]} : vector<16x32xf32> to vector<16x16xf32>
    %184 = tpu.concatenate %182, %183 in 0 : vector<8x16xf32>, vector<16x16xf32> -> vector<24x16xf32>
    %c2_154 = arith.constant 2 : index
    %c0_155 = arith.constant 0 : index
    %c0_156 = arith.constant 0 : index
    %185 = vector.load %arg10[%c2_154, %c0_155, %c0_156] : memref<3x16x24xf32, #tpu.memory_space<vmem>>, vector<1x16x24xf32>
    %186 = vector.shape_cast %185 : vector<1x16x24xf32> to vector<16x24xf32>
    %cst_157 = arith.constant dense<0.000000e+00> : vector<16x16xf32>
    %187 = tpu.matmul %186, %181, %cst_157 {dimension_numbers = #tpu.dot_dimension_numbers<[1], [0], [0], [1], [0, 0, 1, 1], [], []>} : vector<16x24xf32>, vector<24x16xf32>, vector<16x16xf32> -> vector<16x16xf32>
    %c2_158 = arith.constant 2 : index
    %c0_159 = arith.constant 0 : index
    %c0_160 = arith.constant 0 : index
    %188 = vector.load %arg11[%c2_158, %c0_159, %c0_160] : memref<3x8x24xf32, #tpu.memory_space<vmem>>, vector<1x8x24xf32>
    %189 = vector.shape_cast %188 : vector<1x8x24xf32> to vector<8x24xf32>
    %cst_161 = arith.constant dense<0.000000e+00> : vector<8x16xf32>
    %190 = tpu.matmul %189, %184, %cst_161 {dimension_numbers = #tpu.dot_dimension_numbers<[1], [0], [0], [1], [0, 0, 1, 1], [], []>} : vector<8x24xf32>, vector<24x16xf32>, vector<8x16xf32> -> vector<8x16xf32>
    %191 = vector.extract_strided_slice %136 {offsets = [0, 16], sizes = [16, 16], strides = [1, 1]} : vector<16x32xf32> to vector<16x16xf32>
    %192 = arith.addf %187, %191 : vector<16x16xf32>
    %193 = vector.extract_strided_slice %138 {offsets = [0, 16], sizes = [8, 16], strides = [1, 1]} : vector<8x32xf32> to vector<8x16xf32>
    %194 = arith.addf %190, %193 : vector<8x16xf32>
    %c2_162 = arith.constant 2 : index
    %c0_163 = arith.constant 0 : index
    %c0_164 = arith.constant 0 : index
    %195 = vector.load %arg14[%c2_162, %c0_163, %c0_164] : memref<3x1x16xf32, #tpu.memory_space<vmem>>, vector<1x1x16xf32>
    %196 = vector.shape_cast %195 : vector<1x1x16xf32> to vector<1x16xf32>
    %197 = vector.broadcast %196 : vector<1x16xf32> to vector<16x16xf32>
    %198 = arith.addf %192, %197 : vector<16x16xf32>
    %cst_165 = arith.constant 0.000000e+00 : f32
    %199 = vector.broadcast %cst_165 : f32 to vector<16x16xf32>
    %200 = arith.maximumf %198, %199 : vector<16x16xf32>
    %c2_166 = arith.constant 2 : index
    %c0_167 = arith.constant 0 : index
    %c0_168 = arith.constant 0 : index
    %201 = vector.load %arg15[%c2_166, %c0_167, %c0_168] : memref<3x1x16xf32, #tpu.memory_space<vmem>>, vector<1x1x16xf32>
    %202 = vector.shape_cast %201 : vector<1x1x16xf32> to vector<1x16xf32>
    %203 = vector.broadcast %202 : vector<1x16xf32> to vector<8x16xf32>
    %204 = arith.addf %194, %203 : vector<8x16xf32>
    %cst_169 = arith.constant 0.000000e+00 : f32
    %205 = vector.broadcast %cst_169 : f32 to vector<8x16xf32>
    %206 = arith.maximumf %204, %205 : vector<8x16xf32>
    %207 = tpu.concatenate %128, %166, %200 in 1 : vector<16x16xf32>, vector<16x16xf32>, vector<16x16xf32> -> vector<16x48xf32>
    %208 = tpu.concatenate %134, %172, %206 in 1 : vector<8x16xf32>, vector<8x16xf32>, vector<8x16xf32> -> vector<8x48xf32>
    %c0_170 = arith.constant 0 : index
    %c0_171 = arith.constant 0 : index
    %209 = vector.load %arg18[%c0_170, %c0_171] : memref<48x16xf32, #tpu.memory_space<vmem>>, vector<48x16xf32>
    %cst_172 = arith.constant dense<0.000000e+00> : vector<16x16xf32>
    %210 = tpu.matmul %207, %209, %cst_172 {dimension_numbers = #tpu.dot_dimension_numbers<[1], [0], [0], [1], [0, 0, 1, 1], [], []>} : vector<16x48xf32>, vector<48x16xf32>, vector<16x16xf32> -> vector<16x16xf32>
    %c0_173 = arith.constant 0 : index
    %c0_174 = arith.constant 0 : index
    %211 = vector.load %arg19[%c0_173, %c0_174] : memref<1x16xf32, #tpu.memory_space<vmem>>, vector<1x16xf32>
    %212 = vector.broadcast %211 : vector<1x16xf32> to vector<16x16xf32>
    %213 = arith.addf %210, %212 : vector<16x16xf32>
    %c0_175 = arith.constant 0 : index
    %c0_176 = arith.constant 0 : index
    %214 = vector.load %arg22[%c0_175, %c0_176] : memref<16x16xf32, #tpu.memory_space<vmem>>, vector<16x16xf32>
    tpu.vector_store %arg22[%c0_175, %c0_176], %213 {strides = array<i32>} : memref<16x16xf32, #tpu.memory_space<vmem>>, vector<16x16xf32>,
    %c0_177 = arith.constant 0 : index
    %c0_178 = arith.constant 0 : index
    %215 = vector.load %arg20[%c0_177, %c0_178] : memref<48x16xf32, #tpu.memory_space<vmem>>, vector<48x16xf32>
    %cst_179 = arith.constant dense<0.000000e+00> : vector<8x16xf32>
    %216 = tpu.matmul %208, %215, %cst_179 {dimension_numbers = #tpu.dot_dimension_numbers<[1], [0], [0], [1], [0, 0, 1, 1], [], []>} : vector<8x48xf32>, vector<48x16xf32>, vector<8x16xf32> -> vector<8x16xf32>
    %c0_180 = arith.constant 0 : index
    %c0_181 = arith.constant 0 : index
    %217 = vector.load %arg21[%c0_180, %c0_181] : memref<1x16xf32, #tpu.memory_space<vmem>>, vector<1x16xf32>
    %218 = vector.broadcast %217 : vector<1x16xf32> to vector<8x16xf32>
    %219 = arith.addf %216, %218 : vector<8x16xf32>
    %c0_182 = arith.constant 0 : index
    %c0_183 = arith.constant 0 : index
    %220 = vector.load %arg23[%c0_182, %c0_183] : memref<8x16xf32, #tpu.memory_space<vmem>>, vector<8x16xf32>
    tpu.vector_store %arg23[%c0_182, %c0_183], %219 {strides = array<i32>} : memref<8x16xf32, #tpu.memory_space<vmem>>, vector<8x16xf32>,
    return
  }
}

</mosaic_0001>

<bundles_post_ra>
// kernel: tpu_custom_call.1
= control target key start
LH: loop header
LB: loop body
LE: loop exit
PB: predicated region body
PF: predicated region fallthrough
CT: control target
= control target key end

     0   :  { %s5034_s0 = inlined_call_operand.hbm [shape: f32[3,16,16], index: 0, kind: input, shape index: {}]   ;;  %s5035_s1 = inlined_call_operand.hbm [shape: f32[3,8,16], index: 1, kind: input, shape index: {}]   ;;  %s5036_s2 = inlined_call_operand.vmem [shape: f32[3,24,16], index: 2, kind: input, shape index: {}]   ;;  %s5037_s3 = inlined_call_operand.vmem [shape: f32[3,24,8], index: 3, kind: input, shape index: {}]   ;;  %s5038_s4 = inlined_call_operand.vmem [shape: f32[3,32,32], index: 4, kind: input, shape index: {}]   ;;  %s5039_s5 = inlined_call_operand.vmem [shape: f32[3,32,32], index: 5, kind: input, shape index: {}]   ;;  %s5040_s6 = inlined_call_operand.vmem [shape: f32[3,1,32], index: 6, kind: input, shape index: {}]   ;;  %s5041_s7 = inlined_call_operand.hbm [shape: f32[3,1,32], index: 7, kind: input, shape index: {}]   ;;  %s5042_s8 = inlined_call_operand.hbm [shape: f32[32,64], index: 8, kind: input, shape index: {}]   ;;  %s5043_s9 = inlined_call_operand.hbm [shape: f32[32,64], index: 9, kind: input, shape index: {}]   ;;  %s5044_s10 = inlined_call_operand.hbm [shape: f32[3,16,24], index: 10, kind: input, shape index: {}]   ;;  %s5045_s11 = inlined_call_operand.hbm [shape: f32[3,8,24], index: 11, kind: input, shape index: {}]   ;;  %s5046_s12 = inlined_call_operand.vmem [shape: f32[3,32,32], index: 12, kind: input, shape index: {}]   ;;  %s5047_s13 = inlined_call_operand.vmem [shape: f32[3,32,32], index: 13, kind: input, shape index: {}]   ;;  %s5048_s14 = inlined_call_operand.hbm [shape: f32[3,1,16], index: 14, kind: input, shape index: {}]   ;;  %s5049_s15 = inlined_call_operand.hbm [shape: f32[3,1,16], index: 15, kind: input, shape index: {}]   ;;  %s5050_s16 = inlined_call_operand.vmem [shape: f32[16,32], index: 16, kind: input, shape index: {}]   ;;  %s5051_s17 = inlined_call_operand.hbm [shape: f32[16,32], index: 17, kind: input, shape index: {}]   ;;  %s5052_s18 = inlined_call_operand.vmem [shape: f32[48,16], index: 18, kind: input, shape index: {}]   ;;  %s5053_s19 = inlined_call_operand.hbm [shape: f32[1,16], index: 19, kind: input, shape index: {}]   ;;  %s5054_s20 = inlined_call_operand.vmem [shape: f32[48,16], index: 20, kind: input, shape index: {}]   ;;  %s5055_s21 = inlined_call_operand.hbm [shape: f32[1,16], index: 21, kind: input, shape index: {}]   ;;  %s5056_s22 = inlined_call_operand.hbm [shape: f32[16,16], index: 22, kind: output, shape index: {0}]   ;;  %s5057_s23 = inlined_call_operand.hbm [shape: f32[8,16], index: 23, kind: output, shape index: {1}]  }
   0x1   :  { %5068 = sst [smem:[#allocation34_spill]] %s5034_s0 }
   0x2   :  { %5069 = sst [smem:[#allocation35_spill]] %s5035_s1 }
   0x3   :  { %5070 = sst [smem:[#allocation36_spill]] %s5036_s2 }
   0x4   :  { %5071 = sst [smem:[#allocation37_spill]] %s5037_s3 }
   0x5   :  { %5072 = sst [smem:[#allocation38_spill]] %s5038_s4 }
   0x6   :  { %5073 = sst [smem:[#allocation39_spill]] %s5039_s5 }
   0x7   :  { %5074 = sst [smem:[#allocation40_spill]] %s5040_s6 }
   0x8   :  { %5075 = sst [smem:[#allocation41_spill]] %s5041_s7 }
   0x9   :  { %29 = vsyncpa [#allocation3], 0 }
   0xa   :  { %30 = vsyncpa [#allocation6], 0 }
   0xb   :  { %31 = vsyncpa [#allocation9], 0 }
   0xc   :  { %32 = vsyncpa [#allocation12], 0 }
   0xd   :  { %33 = vsyncpa [#allocation15], 0 }
   0xe   :  { %34 = vsyncpa [#allocation18], 0 }
   0xf   :  { %35 = vsyncpa [#allocation21], 0 }
  0x10   :  { %36 = vsyncpa [#allocation4], 0 }
  0x11   :  { %37 = vsyncpa [#allocation24], 0  ;;  %s4163_s4 = smov [#allocation5]   ;;  %s4164_s24 = smov [#allocation8]  }
  0x12   :  { %s55_s30 = sshll.u32 %s4163_s4, 4  ;;  %s89_s25 = sshll.u32 %s4164_s24, 4  ;;  %s56_s30 = int_to_ptr.vmem [resolvable:$true] %s55_s30  ;;  %s4307_s25 = int_to_ptr.vmem [resolvable:$true] %s89_s25 }
  0x13   :  { %s5076_s26 = sld [smem:[#allocation35_spill]] }
  0x19   :  { %s3837_s2 = scalar_lea.hbm %s5076_s26, 384 }
  0x1a   :  { %p3838_p0 = scmp.ne.s32.totalorder %s5076_s26, %s3837_s2  ;;  %p3841_p1 = scmp.lt.u32.totalorder %s3837_s2, %s5076_s26 }
  0x1c   :  { %p3843_p2 = pnand %p3841_p1, %p3838_p0 }
  0x1e   :  { %3846 = shalt.err (!%p3843_p2)
}
  0x1f   :  { %s3847_s29 = scalar_lea.vmem %s56_s30, 384  ;;  %p3852_p4 = scmp.lt.s32.totalorder %s56_s30, %s56_s30 }
  0x20   :  { %p3848_p3 = scmp.ne.s32.totalorder %s56_s30, %s3847_s29  ;;  %p3853_p5 = scmp.lt.s32.totalorder %s3847_s29, %s3847_s29 }
  0x22   :  { %p3854_p6 = por %p3853_p5, %p3852_p4 }
  0x24   :  { %p3855_p7 = pnand %p3854_p6, %p3848_p3 }
  0x26   :  { %3858 = shalt.err (!%p3855_p7)
}
  0x27   :  { %s4165_s3 = smov 128   ;;  %s4166_s0 = smov 8  }
  0x28   :  { %61 = dma.hbm_to_vmem [thread:$0]  %s5076_s26, 384, %s56_s30, [#allocation6], %s4165_s3, %s4165_s3, %s4166_s0  }
  0x29   :  { %s3859_s2 = scalar_lea.hbm %s5042_s8, 512 }
  0x2a   :  { %p3860_p8 = scmp.ne.s32.totalorder %s5042_s8, %s3859_s2  ;;  %p3863_p9 = scmp.lt.u32.totalorder %s3859_s2, %s5042_s8 }
  0x2c   :  { %p3865_p10 = pnand %p3863_p9, %p3860_p8 }
  0x2e   :  { %3868 = shalt.err (!%p3865_p10)
}
  0x2f   :  { %s3869_s29 = scalar_lea.vmem %s4307_s25, 512  ;;  %p3874_p12 = scmp.lt.s32.totalorder %s4307_s25, %s4307_s25 }
  0x30   :  { %p3870_p11 = scmp.ne.s32.totalorder %s4307_s25, %s3869_s29  ;;  %p3875_p13 = scmp.lt.s32.totalorder %s3869_s29, %s3869_s29 }
  0x32   :  { %p3876_p0 = por %p3875_p13, %p3874_p12 }
  0x34   :  { %p3877_p1 = pnand %p3876_p0, %p3870_p11 }
  0x36   :  { %3880 = shalt.err (!%p3877_p1)
}
  0x37   :  { %95 = dma.hbm_to_vmem [thread:$0]  %s5042_s8, 512, %s4307_s25, [#allocation9], %s4165_s3, %s4165_s3, %s4166_s0  }
  0x38   :  { %s4167_s4 = smov [#allocation11]   ;;  %s3881_s2 = scalar_lea.hbm %s5044_s10, 768 }
  0x39   :  { %s113_s24 = sshll.u32 %s4167_s4, 4  ;;  %p3882_p2 = scmp.ne.s32.totalorder %s5044_s10, %s3881_s2  ;;  %s114_s24 = int_to_ptr.vmem [resolvable:$true] %s113_s24 }
  0x3a   :  { %p3885_p3 = scmp.lt.u32.totalorder %s3881_s2, %s5044_s10 }
  0x3c   :  { %p3887_p4 = pnand %p3885_p3, %p3882_p2 }
  0x3e   :  { %3890 = shalt.err (!%p3887_p4)
}
  0x3f   :  { %s3891_s29 = scalar_lea.vmem %s114_s24, 768  ;;  %p3896_p6 = scmp.lt.s32.totalorder %s114_s24, %s114_s24 }
  0x40   :  { %p3892_p5 = scmp.ne.s32.totalorder %s114_s24, %s3891_s29  ;;  %p3897_p7 = scmp.lt.s32.totalorder %s3891_s29, %s3891_s29 }
  0x42   :  { %p3898_p8 = por %p3897_p7, %p3896_p6 }
  0x44   :  { %p3899_p9 = pnand %p3898_p8, %p3892_p5 }
  0x46   :  { %3902 = shalt.err (!%p3899_p9)
}
  0x47   :  { %119 = dma.hbm_to_vmem [thread:$0]  %s5044_s10, 768, %s114_s24, [#allocation12], %s4165_s3, %s4165_s3, %s4166_s0  }
  0x48   :  { %s4168_s30 = smov [#allocation14]   ;;  %s4169_s4 = smov [#allocation17]  }
  0x49   :  { %s141_s26 = sshll.u32 %s4168_s30, 4  ;;  %s167_s5 = sshll.u32 %s4169_s4, 4  ;;  %s142_s26 = int_to_ptr.vmem [resolvable:$true] %s141_s26  ;;  %s168_s5 = int_to_ptr.vmem [resolvable:$true] %s167_s5 }
  0x4a   :  { %s3903_s6 = scalar_lea.hbm %s5048_s14, 48 }
  0x4b   :  { %p3904_p10 = scmp.ne.s32.totalorder %s5048_s14, %s3903_s6  ;;  %p3907_p11 = scmp.lt.u32.totalorder %s3903_s6, %s5048_s14 }
  0x4d   :  { %p3909_p12 = pnand %p3907_p11, %p3904_p10 }
  0x4f   :  { %3912 = shalt.err (!%p3909_p12)
}
  0x50   :  { %s3913_s10 = scalar_lea.vmem %s142_s26, 48  ;;  %s3917_s24 = scalar_lea.vmem %s142_s26, 64 }
  0x51   :  { %p3914_p13 = scmp.ne.s32.totalorder %s142_s26, %s3913_s10  ;;  %p3918_p0 = scmp.lt.s32.totalorder %s142_s26, %s142_s26 }
  0x52   :  { %p3919_p1 = scmp.lt.s32.totalorder %s3917_s24, %s3913_s10 }
  0x54   :  { %p3920_p2 = por %p3919_p1, %p3918_p0 }
  0x56   :  { %p3921_p3 = pnand %p3920_p2, %p3914_p13 }
  0x58   :  { %3924 = shalt.err (!%p3921_p3)
}
  0x59   :  { %s5066_s8 = smov 16   ;;  %s4171_s25 = smov 1  }
  0x5a   :  { %147 = dma.hbm_to_vmem [thread:$0]  %s5048_s14, 48, %s142_s26, [#allocation15], %s5066_s8, %s5066_s8, %s4171_s25  }
  0x5b   :  { %s3925_s6 = scalar_lea.hbm %s5051_s17, 256 }
  0x5c   :  { %p3926_p4 = scmp.ne.s32.totalorder %s5051_s17, %s3925_s6  ;;  %p3929_p5 = scmp.lt.u32.totalorder %s3925_s6, %s5051_s17 }
  0x5e   :  { %p3931_p6 = pnand %p3929_p5, %p3926_p4 }
  0x60   :  { %3934 = shalt.err (!%p3931_p6)
}
  0x61   :  { %s3935_s10 = scalar_lea.vmem %s168_s5, 256  ;;  %p3940_p8 = scmp.lt.s32.totalorder %s168_s5, %s168_s5 }
  0x62   :  { %p3936_p7 = scmp.ne.s32.totalorder %s168_s5, %s3935_s10  ;;  %p3941_p9 = scmp.lt.s32.totalorder %s3935_s10, %s3935_s10 }
  0x64   :  { %p3942_p10 = por %p3941_p9, %p3940_p8 }
  0x66   :  { %p3943_p11 = pnand %p3942_p10, %p3936_p7 }
  0x68   :  { %3946 = shalt.err (!%p3943_p11)
}
  0x69   :  { %173 = dma.hbm_to_vmem [thread:$0]  %s5051_s17, 256, %s168_s5, [#allocation18], %s4165_s3, %s4165_s3, %s4166_s0  }
  0x6a   :  { %s4172_s24 = smov [#allocation2]   ;;  %s4173_s4 = smov [#allocation7]  }
  0x6b   :  { %s43_s30 = sshll.u32 %s4172_s24, 4  ;;  %s77_s1 = sshll.u32 %s4173_s4, 4  ;;  %s44_s30 = int_to_ptr.vmem [resolvable:$true] %s43_s30  ;;  %s78_s1 = int_to_ptr.vmem [resolvable:$true] %s77_s1 }
  0x6c   :  { %s5077_s27 = sld [smem:[#allocation34_spill]] }
  0x72   :  { %s3947_s7 = scalar_lea.hbm %s5077_s27, 768 }
  0x73   :  { %p3948_p12 = scmp.ne.s32.totalorder %s5077_s27, %s3947_s7  ;;  %p3951_p13 = scmp.lt.u32.totalorder %s3947_s7, %s5077_s27 }
  0x75   :  { %p3953_p0 = pnand %p3951_p13, %p3948_p12 }
  0x77   :  { %3956 = shalt.err (!%p3953_p0)
}
  0x78   :  { %s3957_s17 = scalar_lea.vmem %s44_s30, 768  ;;  %p3962_p2 = scmp.lt.s32.totalorder %s44_s30, %s44_s30 }
  0x79   :  { %p3958_p1 = scmp.ne.s32.totalorder %s44_s30, %s3957_s17  ;;  %p3963_p3 = scmp.lt.s32.totalorder %s3957_s17, %s3957_s17 }
  0x7b   :  { %p3964_p4 = por %p3963_p3, %p3962_p2 }
  0x7d   :  { %p3965_p5 = pnand %p3964_p4, %p3958_p1 }
  0x7f   :  { %3968 = shalt.err (!%p3965_p5)
}
  0x80   :  { %49 = dma.hbm_to_vmem [thread:$0]  %s5077_s27, 768, %s44_s30, [#allocation3], %s4165_s3, %s4165_s3, %s4166_s0  }
  0x81   :  { %s5078_s24 = sld [smem:[#allocation41_spill]] }
  0x87   :  { %s3969_s4 = scalar_lea.hbm %s5078_s24, 48 }
  0x88   :  { %p3970_p6 = scmp.ne.s32.totalorder %s5078_s24, %s3969_s4  ;;  %p3973_p7 = scmp.lt.u32.totalorder %s3969_s4, %s5078_s24 }
  0x8a   :  { %p3975_p8 = pnand %p3973_p7, %p3970_p6 }
  0x8c   :  { %3978 = shalt.err (!%p3975_p8)
}
  0x8d   :  { %s3979_s29 = scalar_lea.vmem %s78_s1, 48  ;;  %s3983_s10 = scalar_lea.vmem %s78_s1, 64 }
  0x8e   :  { %p3980_p9 = scmp.ne.s32.totalorder %s78_s1, %s3979_s29  ;;  %p3984_p10 = scmp.lt.s32.totalorder %s78_s1, %s78_s1 }
  0x8f   :  { %p3985_p11 = scmp.lt.s32.totalorder %s3983_s10, %s3979_s29 }
  0x91   :  { %p3986_p12 = por %p3985_p11, %p3984_p10 }
  0x93   :  { %p3987_p13 = pnand %p3986_p12, %p3980_p9 }
  0x95   :  { %3990 = shalt.err (!%p3987_p13)
}
  0x96   :  { %s5079_s30 = smov 16   ;;  %s4174_s5 = smov [#allocation10]  }
  0x97   :  { %83 = dma.hbm_to_vmem [thread:$0]  %s5078_s24, 48, %s78_s1, [#allocation6], %s5079_s30, %s5079_s30, %s4171_s25  }
  0x98   :  { %s101_s14 = sshll.u32 %s4174_s5, 4  ;;  %s4175_s26 = smov [#allocation13]   ;;  %s102_s14 = int_to_ptr.vmem [resolvable:$true] %s101_s14 }
  0x99   :  { %s125_s8 = sshll.u32 %s4175_s26, 4  ;;  %s3991_s6 = scalar_lea.hbm %s5043_s9, 512  ;;  %s126_s8 = int_to_ptr.vmem [resolvable:$true] %s125_s8 }
  0x9a   :  { %p3992_p0 = scmp.ne.s32.totalorder %s5043_s9, %s3991_s6  ;;  %p3995_p1 = scmp.lt.u32.totalorder %s3991_s6, %s5043_s9 }
  0x9c   :  { %p3997_p2 = pnand %p3995_p1, %p3992_p0 }
  0x9e   :  { %4000 = shalt.err (!%p3997_p2)
}
  0x9f   :  { %s4001_s1 = scalar_lea.vmem %s102_s14, 512  ;;  %p4006_p4 = scmp.lt.s32.totalorder %s102_s14, %s102_s14 }
  0xa0   :  { %p4002_p3 = scmp.ne.s32.totalorder %s102_s14, %s4001_s1  ;;  %p4007_p5 = scmp.lt.s32.totalorder %s4001_s1, %s4001_s1 }
  0xa2   :  { %p4008_p6 = por %p4007_p5, %p4006_p4 }
  0xa4   :  { %p4009_p7 = pnand %p4008_p6, %p4002_p3 }
  0xa6   :  { %4012 = shalt.err (!%p4009_p7)
}
  0xa7   :  { %107 = dma.hbm_to_vmem [thread:$0]  %s5043_s9, 512, %s102_s14, [#allocation9], %s4165_s3, %s4165_s3, %s4166_s0  }
  0xa8   :  { %s4013_s26 = scalar_lea.hbm %s5045_s11, 384 }
  0xa9   :  { %p4014_p8 = scmp.ne.s32.totalorder %s5045_s11, %s4013_s26  ;;  %p4017_p9 = scmp.lt.u32.totalorder %s4013_s26, %s5045_s11 }
  0xab   :  { %p4019_p10 = pnand %p4017_p9, %p4014_p8 }
  0xad   :  { %4022 = shalt.err (!%p4019_p10)
}
  0xae   :  { %s4023_s28 = scalar_lea.vmem %s126_s8, 384  ;;  %p4028_p12 = scmp.lt.s32.totalorder %s126_s8, %s126_s8 }
  0xaf   :  { %p4024_p11 = scmp.ne.s32.totalorder %s126_s8, %s4023_s28  ;;  %p4029_p13 = scmp.lt.s32.totalorder %s4023_s28, %s4023_s28 }
  0xb1   :  { %p4030_p0 = por %p4029_p13, %p4028_p12 }
  0xb3   :  { %p4031_p1 = pnand %p4030_p0, %p4024_p11 }
  0xb5   :  { %4034 = shalt.err (!%p4031_p1)
}
  0xb6   :  { %131 = dma.hbm_to_vmem [thread:$0]  %s5045_s11, 384, %s126_s8, [#allocation12], %s4165_s3, %s4165_s3, %s4166_s0  }
  0xb7   :  { %s4176_s29 = smov [#allocation16]   ;;  %s4177_s1 = smov [#allocation19]  }
  0xb8   :  { %s153_s10 = sshll.u32 %s4176_s29, 4  ;;  %s182_s24 = sshll.u32 %s4177_s1, 4  ;;  %s154_s10 = int_to_ptr.vmem [resolvable:$true] %s153_s10  ;;  %s183_s24 = int_to_ptr.vmem [resolvable:$true] %s182_s24 }
  0xb9   :  { %s4035_s5 = scalar_lea.hbm %s5049_s15, 48 }
  0xba   :  { %p4036_p2 = scmp.ne.s32.totalorder %s5049_s15, %s4035_s5  ;;  %p4039_p3 = scmp.lt.u32.totalorder %s4035_s5, %s5049_s15 }
  0xbc   :  { %p4041_p4 = pnand %p4039_p3, %p4036_p2 }
  0xbe   :  { %4044 = shalt.err (!%p4041_p4)
}
  0xbf   :  { %s4045_s11 = scalar_lea.vmem %s154_s10, 48  ;;  %s4049_s8 = scalar_lea.vmem %s154_s10, 64 }
  0xc0   :  { %p4046_p5 = scmp.ne.s32.totalorder %s154_s10, %s4045_s11  ;;  %p4050_p6 = scmp.lt.s32.totalorder %s154_s10, %s154_s10 }
  0xc1   :  { %p4051_p7 = scmp.lt.s32.totalorder %s4049_s8, %s4045_s11 }
  0xc3   :  { %p4052_p8 = por %p4051_p7, %p4050_p6 }
  0xc5   :  { %p4053_p9 = pnand %p4052_p8, %p4046_p5 }
  0xc7   :  { %4056 = shalt.err (!%p4053_p9)
}
  0xc8   :  { %159 = dma.hbm_to_vmem [thread:$0]  %s5049_s15, 48, %s154_s10, [#allocation15], %s5079_s30, %s5079_s30, %s4171_s25  }
  0xc9   :  { %s4057_s29 = scalar_lea.hbm %s5053_s19, 16 }
  0xca   :  { %p4058_p10 = scmp.ne.s32.totalorder %s5053_s19, %s4057_s29  ;;  %p4061_p11 = scmp.lt.u32.totalorder %s4057_s29, %s5053_s19 }
  0xcc   :  { %p4063_p12 = pnand %p4061_p11, %p4058_p10 }
  0xce   :  { %4066 = shalt.err (!%p4063_p12)
}
  0xcf   :  { %s4067_s26 = scalar_lea.vmem %s183_s24, 16  ;;  %s4071_s4 = scalar_lea.vmem %s183_s24, 32 }
  0xd0   :  { %p4068_p13 = scmp.ne.s32.totalorder %s183_s24, %s4067_s26  ;;  %p4072_p0 = scmp.lt.s32.totalorder %s183_s24, %s183_s24 }
  0xd1   :  { %p4073_p1 = scmp.lt.s32.totalorder %s4071_s4, %s4067_s26 }
  0xd3   :  { %p4074_p2 = por %p4073_p1, %p4072_p0 }
  0xd5   :  { %p4075_p3 = pnand %p4074_p2, %p4068_p13 }
  0xd7   :  { %4078 = shalt.err (!%p4075_p3)
}
  0xd8   :  { %185 = dma.hbm_to_vmem [thread:$0]  %s5053_s19, 16, %s183_s24, [#allocation18]  }
  0xd9   :  { %s4178_s10 = smov [#allocation20]   ;;  %s4079_s8 = scalar_lea.hbm %s5055_s21, 16 }
  0xda   :  { %s194_s2 = sshll.u32 %s4178_s10, 4  ;;  %p4080_p4 = scmp.ne.s32.totalorder %s5055_s21, %s4079_s8  ;;  %s195_s2 = int_to_ptr.vmem [resolvable:$true] %s194_s2 }
  0xdb   :  { %p4083_p5 = scmp.lt.u32.totalorder %s4079_s8, %s5055_s21 }
  0xdd   :  { %p4085_p6 = pnand %p4083_p5, %p4080_p4 }
  0xdf   :  { %4088 = shalt.err (!%p4085_p6)
}
  0xe0   :  { %s4089_s29 = scalar_lea.vmem %s195_s2, 16  ;;  %s4093_s19 = scalar_lea.vmem %s195_s2, 32 }
  0xe1   :  { %p4090_p7 = scmp.ne.s32.totalorder %s195_s2, %s4089_s29  ;;  %p4094_p8 = scmp.lt.s32.totalorder %s195_s2, %s195_s2 }
  0xe2   :  { %p4095_p9 = scmp.lt.s32.totalorder %s4093_s19, %s4089_s29 }
  0xe4   :  { %p4096_p10 = por %p4095_p9, %p4094_p8 }
  0xe6   :  { %p4097_p11 = pnand %p4096_p10, %p4090_p7 }
  0xe8   :  { %4100 = shalt.err (!%p4097_p11)
}
  0xe9   :  { %197 = dma.hbm_to_vmem [thread:$0]  %s5055_s21, 16, %s195_s2, [#allocation21]  }
  0xea   :  { %4145 = dma.done.wait [#allocation3], 768  }
  0xeb   :  { %4146 = vsyncadd [#allocation3], 4294966528 }
  0xec   :  { %4147 = dma.done.wait [#allocation6], 432  }
  0xed   :  { %4148 = vsyncadd [#allocation6], 4294966864 }
  0xee   :  { %4149 = dma.done.wait [#allocation9], 1024  }
  0xef   :  { %4150 = vsyncadd [#allocation9], 4294966272 }
  0xf0   :  { %4151 = dma.done.wait [#allocation12], 1152  }
  0xf1   :  { %4152 = vsyncadd [#allocation12], 4294966144 }
  0xf2   :  { %4153 = dma.done.wait [#allocation15], 96  }
  0xf3   :  { %4154 = vsyncadd [#allocation15], 4294967200 }
  0xf4   :  { %4155 = dma.done.wait [#allocation18], 272  }
  0xf5   :  { %4156 = vsyncadd [#allocation18], 4294967024 }
  0xf6   :  { %4157 = dma.done.wait [#allocation21], 16  }
  0xf7   :  { %4158 = vsyncadd [#allocation21], 4294967280  ;;  %v4179_v0 = vmov 0.0   ;;  %vm4180_vm0 = vmmov 0   ;;  %v4181_v1 = vmov 0.0|0.0   ;;  %vm343_vm1 = vcmask 64512  }
  0xf8   :  { %3331 = vmatprep.subr.mxu1 %v4179_v0  ;;  %3333 = vmatprep.mubr.msk.f32.mxu1 %vm4180_vm0, %v4179_v0  ;;  %v242_v2 = vld [vmem:[#allocation5] sm:$0xff]  ;;  %s5080_s17 = sld [smem:[#allocation37_spill]]  ;;  %v234_v4 = vld [vmem:[#allocation2] sm:$0xff]  ;;  %v235_v5 = vld [vmem:[#allocation2 + $0x8] sm:$0xff]  ;;  %s5081_s25 = sld [smem:[#allocation36_spill]]  ;;  %vm250_vm2 = vcmask 130048  }
  0xf9   :  { %3642 = vmatprep.subr.bf16.mxu0 %v4181_v1  ;;  %3322 = vmatprep.mubr.msk.f32.mxu0 %vm4180_vm0, %v4179_v0  ;;  %v3643_v6 = vpack.c.bf16 %v235_v5, %v234_v4  ;;  %s5082_s14 = sld [smem:[#allocation39_spill]]  ;;  %s5083_s4 = sld [smem:[#allocation38_spill]]  ;;  %v713_v36 = vld [vmem:[#allocation10] sm:$0xff]  ;;  %v714_v37 = vld [vmem:[#allocation10 + $0x8] sm:$0xff]  ;;  %vm463_vm3 = vcmask 261120   ;;  %v715_v45 = vld [vmem:[#allocation10 + $0x10] sm:$0xff] }
  0xfa   :  { %3332 = vmatpush3.msra.mxu1 %v242_v2  ;;  %v3668_v38 = vpack.c.bf16 %v714_v37, %v713_v36  ;;  %v716_v46 = vld [vmem:[#allocation10 + $0x18] sm:$0xff]  ;;  %v628_v48 = vld [vmem:[#allocation8] sm:$0xff]  ;;  %v629_v49 = vld [vmem:[#allocation8 + $0x8] sm:$0xff]  ;;  %s5084_s9 = sld [smem:[#allocation40_spill]]  ;;  %vm1739_vm4 = vcmask 195584   ;;  %s4182_s24 = smov 112  }
  0xfb   :  { %3644 = vmatpush3.bf16.msra.mxu0 %v3643_v6  ;;  %v3671_v47 = vpack.c.bf16 %v716_v46, %v715_v45  ;;  %v3659_v50 = vpack.c.bf16 %v629_v49, %v628_v48  ;;  %v630_v51 = vld [vmem:[#allocation8 + $0x10] sm:$0xff]  ;;  %v631_v52 = vld [vmem:[#allocation8 + $0x18] sm:$0xff]  ;;  %s4183_s27 = smov 96   ;;  %s4184_s29 = smov 32   ;;  %vm2843_vm5 = vcmask 392192  }
  0xfc   :  { %3653 = vmatprep.subr.bf16.mxu0 %v4181_v1  ;;  %v3663_v53 = vpack.c.bf16 %v631_v52, %v630_v51  ;;  %v3060_v54 = vld [vmem:[#allocation7] ss:$0 sm:$0xff]  ;;  %v244_v60 = vld [vmem:[#allocation5 + $0x8] sm:$0xff]  ;;  %v246_v45 = vld [vmem:[#allocation5 + $0x10] sm:$0xff] }
  0xfd   :  { %v238_v4 = vld [vmem:[#allocation2 + $0x18] sm:$0xff]  ;;  %v240_v46 = vld [vmem:[#allocation2 + $0x20] sm:$0xff] }
  0xfe   :  { %v340_v3 = vld [vmem:[%s5080_s17] sm:$0xff]  ;;  %v341_v7 = vld [vmem:[%s5080_s17 + $0x8] sm:$0xff]  ;;  %v342_v9 = vld [vmem:[%s5080_s17 + $0x10] sm:$0xff] }
  0xff   :  { %3334 = vmatmul.mubr.msk.f32.vlgmr.msra.gmra.mrb[0].mxu1 %vm343_vm1, %v340_v3  ;;  %v247_v8 = vld [vmem:[%s5081_s25] sm:$0xff]  ;;  %v248_v10 = vld [vmem:[%s5081_s25 + $0x8] sm:$0xff]  ;;  %v249_v11 = vld [vmem:[%s5081_s25 + $0x10] sm:$0xff] }
 0x100   :  { %3336 = vmatprep.mubr.msk.f32.mxu1 %vm4180_vm0, %v4179_v0  ;;  %3323 = vmatmul.mubr.msk.f32.vlgmr.msra.gmra.mrb[0].mxu0 %vm250_vm2, %v247_v8  ;;  %v452_v12 = vld [vmem:[%s5082_s14] sm:$0xff]  ;;  %v453_v13 = vld [vmem:[%s5082_s14 + $0x8] sm:$0xff]  ;;  %v454_v15 = vld [vmem:[%s5082_s14 + $0x10] sm:$0xff] }
 0x101   :  { %3325 = vmatprep.mubr.msk.f32.mxu0 %vm4180_vm0, %v4179_v0  ;;  %v3654_v14 = vpack.c.bf16 %v453_v13, %v452_v12  ;;  %v455_v16 = vld [vmem:[%s5082_s14 + $0x18] sm:$0xff]  ;;  %v448_v17 = vld [vmem:[%s5083_s4] sm:$0xff]  ;;  %v449_v19 = vld [vmem:[%s5083_s4 + $0x8] sm:$0xff] }
 0x102   :  { %v3657_v18 = vpack.c.bf16 %v455_v16, %v454_v15  ;;  %v3645_v20 = vpack.c.bf16 %v449_v19, %v448_v17  ;;  %v450_v21 = vld [vmem:[%s5083_s4 + $0x10] sm:$0xff]  ;;  %v451_v22 = vld [vmem:[%s5083_s4 + $0x18] sm:$0xff]  ;;  %v3057_v59 = vld [vmem:[%s5084_s9] ss:$0 sm:$0xff] }
 0x103   :  { %3337 = vmatmul.mubr.msk.f32.gmra.mrb[2].mxu1 %vm343_vm1, %v341_v7  ;;  %3655 = vmatpush3.bf16.msra.mxu0 %v3654_v14  ;;  %v3649_v23 = vpack.c.bf16 %v451_v22, %v450_v21  ;;  %v3071_v2 = vld [vmem:[%s5080_s17 + $0x18] sm:$0xff]  ;;  %v237_v3 = vld [vmem:[#allocation2 + $0x10] sm:$0xff]  ;;  %v3066_v12 = vld [vmem:[%s5081_s25 + $0x20] sm:$0xff] }
 0x104   :  { %3339 = vmatprep.mubr.msk.f32.mxu1 %vm4180_vm0, %v4179_v0  ;;  %3326 = vmatmul.mubr.msk.f32.gmra.mrb[2].mxu0 %vm250_vm2, %v248_v10  ;;  %v3674_v7 = vpack.c.bf16 %v238_v4, %v237_v3  ;;  %v3065_v10 = vld [vmem:[%s5081_s25 + $0x18] sm:$0xff]  ;;  %v3067_v13 = vld [vmem:[%s5081_s25 + $0x28] sm:$0xff]  ;;  %v3081_v14 = vld [vmem:[%s5082_s14 + $0x20] sm:$0xff] }
 0x105   :  { %3328 = vmatprep.mubr.msk.f32.mxu0 %vm4180_vm0, %v4179_v0  ;;  %3656 = vmatprep.subr.bf16.mxu0 %v4181_v1  ;;  %v3082_v15 = vld [vmem:[%s5082_s14 + $0x28] sm:$0xff]  ;;  %v3083_v17 = vld [vmem:[%s5082_s14 + $0x30] sm:$0xff]  ;;  %v3077_v19 = vld [vmem:[%s5083_s4 + $0x20] sm:$0xff] }
 0x106   :  { %3646 = vmatprep.subr.bf16.mxu1 %v3645_v20  ;;  %v3685_v16 = vpack.c.bf16 %v3082_v15, %v3081_v14  ;;  %v3078_v21 = vld [vmem:[%s5083_s4 + $0x28] sm:$0xff]  ;;  %v3097_v49 = vld [vmem:[%s5080_s17 + $0x30] sm:$0xff]  ;;  %v3110_v14 = vld [vmem:[%s5082_s14 + $0x58] sm:$0xff] }
 0x107   :  { %3340 = vmatmul.mubr.msk.f32.gmra.mrb[4].mxu1 %vm343_vm1, %v342_v9  ;;  %3658 = vmatpush3.bf16.msra.mxu0 %v3657_v18  ;;  %v3072_v9 = vld [vmem:[%s5080_s17 + $0x20] sm:$0xff]  ;;  %v3084_v18 = vld [vmem:[%s5082_s14 + $0x38] sm:$0xff]  ;;  %v3676_v22 = vpack.c.bf16 %v3078_v21, %v3077_v19  ;;  %v3108_v3 = vld [vmem:[%s5082_s14 + $0x48] sm:$0xff] }
 0x108   :  { %3329 = vmatmul.mubr.msk.f32.gmra.mrb[4].mxu0 %vm250_vm2, %v249_v11  ;;  %3667 = vmatprep.subr.bf16.mxu0 %v4181_v1  ;;  %v3073_v11 = vld [vmem:[%s5080_s17 + $0x28] sm:$0xff] }
 0x109   :  { %3361 = vmatprep.mubr.msk.f32.mxu0 %vm4180_vm0, %v4179_v0  ;;  %3648 = vmatpush3.bf16.msra.mxu1 %v3645_v20  ;;  %v3688_v20 = vpack.c.bf16 %v3084_v18, %v3083_v17 }
 0x10a   :  { %3650 = vmatprep.subr.bf16.mxu1 %v3649_v23 }
 0x10d   :  { %3652 = vmatpush3.bf16.msra.mxu1 %v3649_v23  ;;  %v3079_v23 = vld [vmem:[%s5083_s4 + $0x30] sm:$0xff] }
 0x10e   :  { %3660 = vmatprep.subr.bf16.mxu1 %v3659_v50 }
 0x1d2   :  { %v419_v24 = vpop.f32.mrb[0].mxu1 }
 0x1d3   :  { %v3335_v25 = vpop.f32.mrb[1].mxu1  ;;  %v326_v28 = vpop.f32.mrb[0].mxu0 }
 0x1d4   :  { %v3324_v29 = vpop.f32.mrb[1].mxu0 }
 0x1d6   :  { %v424_v26 = vpop.f32.mrb[2].mxu1 }
 0x1d7   :  { %438 = vrot.lane.b32.xlu1 %v424_v26, %s5079_s30  ;;  %v3338_v27 = vpop.f32.mrb[3].mxu1  ;;  %v331_v32 = vpop.f32.mrb[2].mxu0 }
 0x1d8   :  { %v3327_v33 = vpop.f32.mrb[3].mxu0 }
 0x1da   :  { %v429_v30 = vpop.f32.mrb[4].mxu1 }
 0x1db   :  { %440 = vrot.lane.b32.xlu0 %v429_v30, %s5079_s30  ;;  %v3341_v31 = vpop.f32.mrb[5].mxu1  ;;  %v336_v34 = vpop.f32.mrb[4].mxu0 }
 0x1dc   :  { %v3330_v35 = vpop.f32.mrb[5].mxu0 }
 0x1df   :  { %436 = vrot.lane.b32.xlu0 %v419_v24, %s5079_s30  ;;  %v3080_v24 = vld [vmem:[%s5083_s4 + $0x38] sm:$0xff] }
 0x1e0   :  { %v3680_v25 = vpack.c.bf16 %v3080_v24, %v3079_v23 }
 0x249   :  { %v439_v41 = vpop.permute.xlu1 %438 }
 0x24a   :  { %v446_v44 = vsel %vm250_vm2, %v331_v32, %v439_v41 }
 0x24d   :  { %v441_v39 = vpop.permute.xlu0 %440 }
 0x24e   :  { %v447_v40 = vsel %vm250_vm2, %v336_v34, %v441_v39 }
 0x24f   :  { %3362 = vmatmul.mubr.msk.f32.vlgmr.msra.gmra.mrb[6].mxu0 %vm463_vm3, %v447_v40 }
 0x250   :  { %3669 = vmatpush3.bf16.msra.mxu0 %v3668_v38  ;;  %3383 = vmatprep.mubr.msk.f32.mxu0 %vm4180_vm0, %v4179_v0 }
 0x251   :  { %v437_v42 = vpop.permute.xlu0 %436  ;;  %3670 = vmatprep.subr.bf16.mxu0 %v4181_v1 }
 0x252   :  { %v445_v43 = vsel %vm250_vm2, %v326_v28, %v437_v42 }
 0x253   :  { %3350 = vmatprep.mubr.msk.f32.mxu1 %vm463_vm3, %v445_v43 }
 0x254   :  { %3351 = vmatmul.mubr.msk.f32.vlgmr.msra.gmra.mrb[6].mxu1 %vm463_vm3, %v446_v44  ;;  %3672 = vmatpush3.bf16.msra.mxu0 %v3671_v47  ;;  %v241_v47 = vld [vmem:[#allocation2 + $0x28] sm:$0xff] }
 0x255   :  { %3399 = vmatprep.subr.mxu0 %v4179_v0  ;;  %3662 = vmatpush3.bf16.msra.mxu1 %v3659_v50  ;;  %v3691_v50 = vpack.c.bf16 %v241_v47, %v240_v46  ;;  %v1656_v46 = vld [vmem:[%s5047_s13 + $0x8] sm:$0xff] }
 0x256   :  { %3664 = vmatprep.subr.bf16.mxu1 %v3663_v53 }
 0x259   :  { %3666 = vmatpush3.bf16.msra.mxu1 %v3663_v53  ;;  %v3098_v53 = vld [vmem:[%s5080_s17 + $0x38] sm:$0xff] }
 0x25a   :  { %3673 = vmatprep.subr.bf16.mxu1 %v4181_v1 }
 0x322   :  { %v623_v55 = vpop.f32.mrb[6].mxu0 }
 0x323   :  { %v4569_v56 = vadd.f32 %v3060_v54, %v623_v55  ;;  %v3363_v57 = vpop.f32.mrb[7].mxu0  ;;  %v3091_v54 = vld [vmem:[%s5081_s25 + $0x30] sm:$0xff]  ;;  %v3099_v55 = vld [vmem:[%s5080_s17 + $0x40] sm:$0xff] }
 0x324   :  { %v3092_v57 = vld [vmem:[%s5081_s25 + $0x38] sm:$0xff] }
 0x325   :  { %v627_v58 = vmax.f32 %v4569_v56, 0.0 }
 0x327   :  { %v3352_v61 = vpop.f32.mrb[6].mxu1  ;;  %3384 = vmatmul.mubr.msk.f32.vlgmr.msra.gmra.mrb[8].mxu0 %vm463_vm3, %v627_v58 }
 0x328   :  { %v4578_v62 = vadd.f32 %v3352_v61, %v3057_v59  ;;  %v536_v63 = vpop.f32.mrb[7].mxu1  ;;  %3400 = vmatpush3.msra.mxu0 %v244_v60  ;;  %3401 = vmatprep.mubr.msk.f32.mxu0 %vm4180_vm0, %v4179_v0  ;;  %v3103_v60 = vld [vmem:[%s5083_s4 + $0x40] sm:$0xff]  ;;  %v3104_v61 = vld [vmem:[%s5083_s4 + $0x48] sm:$0xff] }
 0x329   :  { %v4585_v5 = vadd.f32 %v3057_v59, %v536_v63  ;;  %3684 = vmatprep.subr.bf16.mxu0 %v4181_v1  ;;  %v3093_v59 = vld [vmem:[%s5081_s25 + $0x40] sm:$0xff] }
 0x32a   :  { %v546_v8 = vmax.f32 %v4578_v62, 0.0  ;;  %v3107_v63 = vld [vmem:[%s5082_s14 + $0x40] sm:$0xff] }
 0x32b   :  { %v545_v6 = vmax.f32 %v4585_v5, 0.0  ;;  %3402 = vmatmul.mubr.msk.f32.vlgmr.msra.gmra.mrb[10].mxu0 %vm343_vm1, %v3071_v2  ;;  %v3693_v2 = vpack.c.bf16 %v3104_v61, %v3103_v60  ;;  %v3702_v4 = vpack.c.bf16 %v3108_v3, %v3107_v63  ;;  %v1730_v61 = vld [vmem:[#allocation11 + $0x8] sm:$0xff]  ;;  %v1916_v63 = vld [vmem:[%s5050_s16] sm:$0xff] }
 0x32c   :  { %3404 = vmatprep.mubr.msk.f32.mxu0 %vm4180_vm0, %v4179_v0  ;;  %3686 = vmatpush3.bf16.msra.mxu0 %v3685_v16 }
 0x32d   :  { %3372 = vmatprep.mubr.msk.f32.mxu1 %vm463_vm3, %v545_v6  ;;  %3687 = vmatprep.subr.bf16.mxu0 %v4181_v1 }
 0x32e   :  { %3373 = vmatmul.mubr.msk.f32.vlgmr.msra.gmra.mrb[8].mxu1 %vm463_vm3, %v546_v8 }
 0x32f   :  { %3405 = vmatmul.mubr.msk.f32.gmra.mrb[12].mxu0 %vm343_vm1, %v3072_v9  ;;  %3675 = vmatpush3.bf16.msra.mxu1 %v3674_v7  ;;  %v3105_v7 = vld [vmem:[%s5083_s4 + $0x50] sm:$0xff]  ;;  %v3106_v9 = vld [vmem:[%s5083_s4 + $0x58] sm:$0xff] }
 0x330   :  { %3407 = vmatprep.mubr.msk.f32.mxu0 %vm4180_vm0, %v4179_v0  ;;  %3390 = vmatprep.mubr.msk.f32.mxu1 %vm4180_vm0, %v4179_v0 }
 0x331   :  { %3689 = vmatpush3.bf16.msra.mxu0 %v3688_v20  ;;  %3677 = vmatprep.subr.bf16.mxu1 %v3676_v22 }
 0x332   :  { %3391 = vmatmul.mubr.msk.f32.vlgmr.msra.gmra.mrb[10].mxu1 %vm250_vm2, %v3065_v10  ;;  %3445 = vmatprep.subr.mxu0 %v4179_v0  ;;  %v3697_v10 = vpack.c.bf16 %v3106_v9, %v3105_v7  ;;  %v3129_v7 = vld [vmem:[%s5046_s12 + $0x28] sm:$0xff] }
 0x333   :  { %3408 = vmatmul.mubr.msk.f32.gmra.mrb[14].mxu0 %vm343_vm1, %v3073_v11  ;;  %3393 = vmatprep.mubr.msk.f32.mxu1 %vm4180_vm0, %v4179_v0  ;;  %v1576_v11 = vld [vmem:[%s5046_s12] sm:$0xff] }
 0x334   :  { %3429 = vmatprep.mubr.msk.f32.mxu0 %vm4180_vm0, %v4179_v0  ;;  %3679 = vmatpush3.bf16.msra.mxu1 %v3676_v22 }
 0x335   :  { %3681 = vmatprep.subr.bf16.mxu1 %v3680_v25 }
 0x336   :  { %3394 = vmatmul.mubr.msk.f32.gmra.mrb[12].mxu1 %vm250_vm2, %v3066_v12  ;;  %v1577_v12 = vld [vmem:[%s5046_s12 + $0x8] sm:$0xff] }
 0x337   :  { %3396 = vmatprep.mubr.msk.f32.mxu1 %vm4180_vm0, %v4179_v0  ;;  %v3707_v15 = vpack.c.bf16 %v1577_v12, %v1576_v11 }
 0x338   :  { %3683 = vmatpush3.bf16.msra.mxu1 %v3680_v25 }
 0x339   :  { %3690 = vmatprep.subr.bf16.mxu1 %v4181_v1 }
 0x33a   :  { %3397 = vmatmul.mubr.msk.f32.gmra.mrb[14].mxu1 %vm250_vm2, %v3067_v13  ;;  %v3109_v13 = vld [vmem:[%s5082_s14 + $0x50] sm:$0xff] }
 0x33b   :  { %v3705_v16 = vpack.c.bf16 %v3110_v14, %v3109_v13  ;;  %v1731_v14 = vld [vmem:[#allocation13] sm:$0xff] }
 0x3fa   :  { %v4655_v26 = vpop.f32.mrb[8].mxu0 }
 0x3fb   :  { %v3385_v27 = vpop.f32.mrb[9].mxu0 }
 0x3fe   :  { %v962_v28 = vpop.f32.mrb[10].mxu0 }
 0x3ff   :  { %979 = vrot.lane.b32.xlu0 %v962_v28, %s5079_s30  ;;  %v3403_v29 = vpop.f32.mrb[11].mxu0 }
 0x401   :  { %v4659_v30 = vpop.f32.mrb[8].mxu1 }
 0x402   :  { %v4661_v31 = vpop.f32.mrb[9].mxu1  ;;  %v967_v32 = vpop.f32.mrb[12].mxu0 }
 0x403   :  { %v3406_v33 = vpop.f32.mrb[13].mxu0 }
 0x405   :  { %v869_v34 = vpop.f32.mrb[10].mxu1 }
 0x406   :  { %v972_v35 = vpop.f32.mrb[14].mxu0  ;;  %v3392_v36 = vpop.f32.mrb[11].mxu1 }
 0x407   :  { %983 = vrot.lane.b32.xlu1 %v972_v35, %s5079_s30  ;;  %v3409_v37 = vpop.f32.mrb[15].mxu0 }
 0x409   :  { %v874_v38 = vpop.f32.mrb[12].mxu1 }
 0x40a   :  { %v3395_v39 = vpop.f32.mrb[13].mxu1 }
 0x40b   :  { %981 = vrot.lane.b32.xlu1 %v967_v32, %s5079_s30 }
 0x40d   :  { %v879_v40 = vpop.f32.mrb[14].mxu1 }
 0x40e   :  { %v3398_v41 = vpop.f32.mrb[15].mxu1 }
 0x40f   :  { %v1578_v41 = vld [vmem:[%s5046_s12 + $0x10] sm:$0xff] }
 0x471   :  { %v980_v42 = vpop.permute.xlu0 %979 }
 0x472   :  { %v988_v43 = vsel %vm250_vm2, %v869_v34, %v980_v42  ;;  %v1579_v42 = vld [vmem:[%s5046_s12 + $0x18] sm:$0xff] }
 0x473   :  { %3418 = vmatprep.mubr.msk.f32.mxu1 %vm463_vm3, %v988_v43 }
 0x479   :  { %v984_v44 = vpop.permute.xlu1 %983 }
 0x47a   :  { %v990_v48 = vsel %vm250_vm2, %v879_v40, %v984_v44  ;;  %v3711_v44 = vpack.c.bf16 %v1579_v42, %v1578_v41  ;;  %v3135_v41 = vld [vmem:[%s5047_s13 + $0x28] sm:$0xff] }
 0x47b   :  { %3430 = vmatmul.mubr.msk.f32.vlgmr.msra.gmra.mrb[16].mxu0 %vm463_vm3, %v990_v48 }
 0x47c   :  { %3446 = vmatpush3.msra.mxu0 %v246_v45  ;;  %3447 = vmatprep.mubr.msk.f32.mxu0 %vm4180_vm0, %v4179_v0  ;;  %v1655_v45 = vld [vmem:[%s5047_s13] sm:$0xff] }
 0x47d   :  { %v982_v51 = vpop.permute.xlu1 %981  ;;  %3701 = vmatprep.subr.bf16.mxu0 %v4181_v1  ;;  %v3716_v48 = vpack.c.bf16 %v1656_v46, %v1655_v45  ;;  %v3136_v46 = vld [vmem:[%s5047_s13 + $0x30] sm:$0xff] }
 0x47e   :  { %v989_v52 = vsel %vm250_vm2, %v874_v38, %v982_v51  ;;  %v1658_v51 = vld [vmem:[%s5047_s13 + $0x18] sm:$0xff] }
 0x47f   :  { %3419 = vmatmul.mubr.msk.f32.vlgmr.msra.gmra.mrb[16].mxu1 %vm463_vm3, %v989_v52  ;;  %3448 = vmatmul.mubr.msk.f32.vlgmr.msra.gmra.mrb[18].mxu0 %vm343_vm1, %v3097_v49 }
 0x480   :  { %3450 = vmatprep.mubr.msk.f32.mxu0 %vm4180_vm0, %v4179_v0  ;;  %3692 = vmatpush3.bf16.msra.mxu1 %v3691_v50  ;;  %v1657_v50 = vld [vmem:[%s5047_s13 + $0x10] sm:$0xff] }
 0x481   :  { %3436 = vmatprep.mubr.msk.f32.mxu1 %vm4180_vm0, %v4179_v0  ;;  %3694 = vmatprep.subr.bf16.mxu1 %v3693_v2  ;;  %v3719_v5 = vpack.c.bf16 %v1658_v51, %v1657_v50 }
 0x482   :  { %3703 = vmatpush3.bf16.msra.mxu0 %v3702_v4  ;;  %v3128_v4 = vld [vmem:[%s5046_s12 + $0x20] sm:$0xff] }
 0x483   :  { %3451 = vmatmul.mubr.msk.f32.gmra.mrb[20].mxu0 %vm343_vm1, %v3098_v53  ;;  %3437 = vmatmul.mubr.msk.f32.vlgmr.msra.gmra.mrb[18].mxu1 %vm250_vm2, %v3091_v54  ;;  %v3735_v9 = vpack.c.bf16 %v3129_v7, %v3128_v4 }
 0x484   :  { %3453 = vmatprep.mubr.msk.f32.mxu0 %vm4180_vm0, %v4179_v0  ;;  %3439 = vmatprep.mubr.msk.f32.mxu1 %vm4180_vm0, %v4179_v0 }
 0x485   :  { %3696 = vmatpush3.bf16.msra.mxu1 %v3693_v2  ;;  %3704 = vmatprep.subr.bf16.mxu0 %v4181_v1  ;;  %v1917_v2 = vld [vmem:[%s5050_s16 + $0x8] sm:$0xff] }
 0x486   :  { %3698 = vmatprep.subr.bf16.mxu1 %v3697_v10  ;;  %3706 = vmatpush3.bf16.msra.mxu0 %v3705_v16  ;;  %v3728_v3 = vpack.c.bf16 %v1917_v2, %v1916_v63  ;;  %v1999_v16 = vld [vmem:[#allocation17] sm:$0xff]  ;;  %v2240_v63 = vld [vmem:[#allocation11 + $0x18] sm:$0xff] }
 0x487   :  { %3454 = vmatmul.mubr.msk.f32.gmra.mrb[22].mxu0 %vm343_vm1, %v3099_v55  ;;  %3440 = vmatmul.mubr.msk.f32.gmra.mrb[20].mxu1 %vm250_vm2, %v3092_v57 }
 0x488   :  { %3442 = vmatprep.mubr.msk.f32.mxu1 %vm4180_vm0, %v4179_v0  ;;  %3475 = vmatprep.mubr.msk.f32.mxu0 %vm4180_vm0, %v4179_v0 }
 0x489   :  { %3700 = vmatpush3.bf16.msra.mxu1 %v3697_v10  ;;  %3715 = vmatprep.subr.bf16.mxu0 %v4181_v1 }
 0x48a   :  { %3708 = vmatprep.subr.bf16.mxu1 %v3707_v15 }
 0x48b   :  { %3443 = vmatmul.mubr.msk.f32.gmra.mrb[22].mxu1 %vm250_vm2, %v3093_v59 }
 0x54e   :  { %v1151_v17 = vpop.f32.mrb[16].mxu0 }
 0x54f   :  { %v4743_v18 = vadd.f32 %v1151_v17, %v4655_v26  ;;  %v3431_v19 = vpop.f32.mrb[17].mxu0  ;;  %v2000_v17 = vld [vmem:[#allocation17 + $0x8] sm:$0xff] }
 0x550   :  { %v3733_v19 = vpack.c.bf16 %v2000_v17, %v1999_v16 }
 0x552   :  { %v3420_v20 = vpop.f32.mrb[16].mxu1  ;;  %v1349_v21 = vpop.f32.mrb[18].mxu0 }
 0x553   :  { %v4746_v22 = vadd.f32 %v3420_v20, %v4659_v30  ;;  %v1073_v23 = vpop.f32.mrb[17].mxu1  ;;  %1366 = vrot.lane.b32.xlu0 %v1349_v21, %s5079_s30  ;;  %v3449_v24 = vpop.f32.mrb[19].mxu0  ;;  %v3120_v20 = vld [vmem:[#allocation14] ss:$0 sm:$0xff]  ;;  %v3089_v21 = vld [vmem:[%s5084_s9 + $0x1] ss:$0 sm:$0xff] }
 0x554   :  { %v4750_v25 = vadd.f32 %v1073_v23, %v4661_v31 }
 0x556   :  { %v1354_v27 = vpop.f32.mrb[20].mxu0  ;;  %v1256_v28 = vpop.f32.mrb[18].mxu1 }
 0x557   :  { %1368 = vrot.lane.b32.xlu1 %v1354_v27, %s5079_s30  ;;  %v3452_v29 = vpop.f32.mrb[21].mxu0  ;;  %v3438_v32 = vpop.f32.mrb[19].mxu1 }
 0x558   :  { %v3130_v32 = vld [vmem:[%s5046_s12 + $0x30] sm:$0xff] }
 0x55a   :  { %v1359_v33 = vpop.f32.mrb[22].mxu0  ;;  %v1261_v34 = vpop.f32.mrb[20].mxu1 }
 0x55b   :  { %1370 = vrot.lane.b32.xlu0 %v1359_v33, %s5079_s30  ;;  %v3455_v35 = vpop.f32.mrb[23].mxu0  ;;  %v3441_v36 = vpop.f32.mrb[21].mxu1  ;;  %v3131_v33 = vld [vmem:[%s5046_s12 + $0x38] sm:$0xff] }
 0x55c   :  { %v3739_v36 = vpack.c.bf16 %v3131_v33, %v3130_v32  ;;  %v3153_v32 = vld [vmem:[%s5047_s13 + $0x58] sm:$0xff] }
 0x55e   :  { %v1266_v37 = vpop.f32.mrb[22].mxu1 }
 0x55f   :  { %v3444_v38 = vpop.f32.mrb[23].mxu1 }
 0x5c5   :  { %v1367_v39 = vpop.permute.xlu0 %1366 }
 0x5c6   :  { %v1375_v40 = vsel %vm250_vm2, %v1256_v28, %v1367_v39  ;;  %v1163_v28 = vadd.f32 %v3089_v21, %v4750_v25  ;;  %v1164_v25 = vadd.f32 %v3089_v21, %v4746_v22  ;;  %v3123_v39 = vld [vmem:[#allocation16] ss:$0 sm:$0xff]  ;;  %v2242_v21 = vld [vmem:[#allocation13 + $0x8] sm:$0xff] }
 0x5c7   :  { %3464 = vmatprep.mubr.msk.f32.mxu1 %vm463_vm3, %v1375_v40  ;;  %v3134_v40 = vld [vmem:[%s5047_s13 + $0x20] sm:$0xff] }
 0x5c8   :  { %v1166_v38 = vmax.f32 %v1164_v25, 0.0  ;;  %v3744_v45 = vpack.c.bf16 %v3135_v41, %v3134_v40 }
 0x5c9   :  { %v1369_v43 = vpop.permute.xlu1 %1368 }
 0x5ca   :  { %v1376_v47 = vsel %vm250_vm2, %v1261_v34, %v1369_v43 }
 0x5cb   :  { %3465 = vmatmul.mubr.msk.f32.vlgmr.msra.gmra.mrb[24].mxu1 %vm463_vm3, %v1376_v47  ;;  %v3137_v47 = vld [vmem:[%s5047_s13 + $0x38] sm:$0xff] }
 0x5cc   :  { %3710 = vmatpush3.bf16.msra.mxu1 %v3707_v15  ;;  %3486 = vmatprep.mubr.msk.f32.mxu1 %vm463_vm3, %v545_v6  ;;  %v1729_v6 = vld [vmem:[#allocation11] sm:$0xff] }
 0x5cd   :  { %v1371_v49 = vpop.permute.xlu0 %1370  ;;  %3712 = vmatprep.subr.bf16.mxu1 %v3711_v44 }
 0x5ce   :  { %v1377_v52 = vsel %vm250_vm2, %v1266_v37, %v1371_v49  ;;  %v1165_v37 = vmax.f32 %v1163_v28, 0.0  ;;  %v3747_v49 = vpack.c.bf16 %v3137_v47, %v3136_v46  ;;  %v3152_v28 = vld [vmem:[%s5047_s13 + $0x50] sm:$0xff] }
 0x5cf   :  { %3476 = vmatmul.mubr.msk.f32.vlgmr.msra.gmra.mrb[24].mxu0 %vm463_vm3, %v1377_v52  ;;  %v3768_v25 = vpack.c.bf16 %v3153_v32, %v3152_v28  ;;  %v3143_v28 = vld [vmem:[#allocation16 + $0x1] ss:$0 sm:$0xff] }
 0x5d0   :  { %3714 = vmatpush3.bf16.msra.mxu1 %v3711_v44  ;;  %3717 = vmatpush3.bf16.msra.mxu0 %v3716_v48  ;;  %v3090_v48 = vld [vmem:[#allocation7 + $0x1] ss:$0 sm:$0xff] }
 0x5d1   :  { %3718 = vmatprep.subr.bf16.mxu0 %v4181_v1  ;;  %3497 = vmatprep.mubr.msk.f32.mxu0 %vm4180_vm0, %v4179_v0  ;;  %v1175_v50 = vadd.f32 %v3090_v48, %v4743_v18 }
 0x5d3   :  { %3487 = vmatmul.mubr.msk.f32.vlgmr.msra.gmra.mrb[26].mxu1 %vm463_vm3, %v546_v8  ;;  %v1176_v51 = vmax.f32 %v1175_v50, 0.0 }
 0x5d4   :  { %3720 = vmatpush3.bf16.msra.mxu0 %v3719_v5  ;;  %3506 = vmatprep.mubr.msk.f32.mxu1 %vm1739_vm4, %v1729_v6  ;;  %v2239_v5 = vld [vmem:[#allocation11 + $0x10] sm:$0xff] }
 0x5d5   :  { %3725 = vmatprep.subr.bf16.mxu0 %v4181_v1 }
 0x5d7   :  { %3498 = vmatmul.mubr.msk.f32.vlgmr.msra.gmra.mrb[26].mxu0 %vm463_vm3, %v627_v58 }
 0x5d8   :  { %3515 = vmatprep.mubr.msk.f32.mxu0 %vm4180_vm0, %v4179_v0 }
 0x69e   :  { %v4794_v53 = vpop.f32.mrb[24].mxu1 }
 0x69f   :  { %v4796_v54 = vpop.f32.mrb[25].mxu1 }
 0x6a2   :  { %v4798_v62 = vpop.f32.mrb[24].mxu0 }
 0x6a3   :  { %v3477_v8 = vpop.f32.mrb[25].mxu0 }
 0x6a6   :  { %v3488_v55 = vpop.f32.mrb[26].mxu1 }
 0x6a7   :  { %v1646_v57 = vpop.f32.mrb[27].mxu1  ;;  %1837 = vrot.lane.b32.xlu0 %v3488_v55, %s4182_s24 }
 0x6a8   :  { %v3721_v56 = vpack.c.bf16 %v3488_v55, %v1646_v57 }
 0x6aa   :  { %v1725_v58 = vpop.f32.mrb[26].mxu0  ;;  %3722 = vmatprep.subr.bf16.mxu1 %v3721_v56 }
 0x6ab   :  { %v3822_v59 = vpack.i.bf16 %v1646_v57, %v1725_v58  ;;  %v3499_v60 = vpop.f32.mrb[27].mxu0  ;;  %3724 = vmatpush3.bf16.msra.mxu1 %v3721_v56 }
 0x6ac   :  { %3504 = vmatprep.subr.mxu1 %v1725_v58  ;;  %v3146_v60 = vld [vmem:[%s5046_s12 + $0x50] sm:$0xff] }
 0x6ad   :  { %3823 = vrot.lane.b32.xlu1 %v3822_v59, %s4182_s24  ;;  %v3145_v59 = vld [vmem:[%s5046_s12 + $0x48] sm:$0xff] }
 0x6af   :  { %3505 = vmatpush3.msra.mxu1 %v1725_v58  ;;  %v3144_v58 = vld [vmem:[%s5046_s12 + $0x40] sm:$0xff] }
 0x6b0   :  { %3507 = vmatmul.mubr.msk.f32.vlgmr.msra.gmra.mrb[28].mxu1 %vm1739_vm4, %v1730_v61  ;;  %3729 = vmatprep.subr.bf16.mxu1 %v3728_v3  ;;  %v3756_v2 = vpack.c.bf16 %v3145_v59, %v3144_v58  ;;  %v2597_v58 = vld [vmem:[#allocation11 + $0x28] sm:$0xff] }
 0x6b1   :  { %3731 = vmatpush3.bf16.msra.mxu1 %v3728_v3 }
 0x6b2   :  { %3736 = vmatprep.subr.bf16.mxu1 %v3735_v9 }
 0x719   :  { %v1838_v15 = vpop.permute.xlu0 %1837 }
 0x71f   :  { %v3824_v10 = vpop.permute.xlu1 %3823 }
 0x720   :  { %v3826_v11 = vunpack.i.h.bf16 %v3824_v10  ;;  %v3825_v12 = vunpack.i.l.bf16 %v3824_v10 }
 0x722   :  { %v3726_v13 = vpack.c.bf16 %v3826_v11, %v3825_v12 }
 0x724   :  { %3727 = vmatpush3.bf16.msra.mxu0 %v3726_v13 }
 0x725   :  { %3513 = vmatprep.subr.mxu0 %v4179_v0 }
 0x728   :  { %3514 = vmatpush3.msra.mxu0 %v1838_v15  ;;  %v3115_v15 = vld [vmem:[%s5084_s9 + $0x2] ss:$0 sm:$0xff] }
 0x729   :  { %3516 = vmatmul.mubr.msk.f32.vlgmr.msra.gmra.mrb[28].mxu0 %vm1739_vm4, %v1731_v14  ;;  %3732 = vmatprep.subr.bf16.mxu0 %v4181_v1 }
 0x72a   :  { %3529 = vmatprep.mubr.msk.f32.mxu0 %vm4180_vm0, %v4179_v0  ;;  %3734 = vmatpush3.bf16.msra.mxu0 %v3733_v19 }
 0x72b   :  { %3743 = vmatprep.subr.bf16.mxu0 %v4181_v1 }
 0x783   :  { %v3508_v23 = vpop.f32.mrb[28].mxu1 }
 0x784   :  { %v4824_v24 = vadd.f32 %v3508_v23, %v3120_v20  ;;  %v1812_v27 = vpop.f32.mrb[29].mxu1 }
 0x785   :  { %v4827_v29 = vadd.f32 %v3120_v20, %v1812_v27 }
 0x786   :  { %v1822_v34 = vmax.f32 %v4824_v24, 0.0 }
 0x787   :  { %v1821_v35 = vmax.f32 %v4827_v29, 0.0 }
 0x789   :  { %3522 = vmatprep.mubr.msk.f32.mxu1 %vm250_vm2, %v1821_v35 }
 0x78a   :  { %3523 = vmatmul.mubr.msk.f32.vlgmr.msra.gmra.mrb[30].mxu1 %vm250_vm2, %v1822_v34 }
 0x78b   :  { %3738 = vmatpush3.bf16.msra.mxu1 %v3735_v9  ;;  %3540 = vmatprep.mubr.msk.f32.mxu1 %vm463_vm3, %v1165_v37 }
 0x78c   :  { %3740 = vmatprep.subr.bf16.mxu1 %v3739_v36 }
 0x78f   :  { %3742 = vmatpush3.bf16.msra.mxu1 %v3739_v36  ;;  %v3116_v36 = vld [vmem:[#allocation7 + $0x2] ss:$0 sm:$0xff] }
 0x792   :  { %3541 = vmatmul.mubr.msk.f32.vlgmr.msra.gmra.mrb[32].mxu1 %vm463_vm3, %v1166_v38 }
 0x793   :  { %3560 = vmatprep.mubr.msk.f32.mxu1 %vm1739_vm4, %v2239_v5 }
 0x7fc   :  { %v1911_v42 = vpop.f32.mrb[28].mxu0 }
 0x7fd   :  { %v4852_v43 = vadd.f32 %v3123_v39, %v1911_v42  ;;  %v3517_v44 = vpop.f32.mrb[29].mxu0 }
 0x7fe   :  { %v2596_v44 = vld [vmem:[#allocation11 + $0x20] sm:$0xff] }
 0x7ff   :  { %v1915_v22 = vmax.f32 %v4852_v43, 0.0 }
 0x801   :  { %3530 = vmatmul.mubr.msk.f32.vlgmr.msra.gmra.mrb[30].mxu0 %vm250_vm2, %v1915_v22 }
 0x802   :  { %3745 = vmatpush3.bf16.msra.mxu0 %v3744_v45  ;;  %3551 = vmatprep.mubr.msk.f32.mxu0 %vm4180_vm0, %v4179_v0 }
 0x803   :  { %3746 = vmatprep.subr.bf16.mxu0 %v4181_v1 }
 0x806   :  { %3748 = vmatpush3.bf16.msra.mxu0 %v3747_v49  ;;  %v3142_v49 = vld [vmem:[#allocation14 + $0x1] ss:$0 sm:$0xff] }
 0x807   :  { %3753 = vmatprep.subr.bf16.mxu0 %v4181_v1 }
 0x809   :  { %3552 = vmatmul.mubr.msk.f32.vlgmr.msra.gmra.mrb[32].mxu0 %vm463_vm3, %v1176_v51 }
 0x80a   :  { %3569 = vmatprep.mubr.msk.f32.mxu0 %vm4180_vm0, %v4179_v0 }
 0x85d   :  { %v4872_v52 = vpop.f32.mrb[30].mxu1 }
 0x85e   :  { %v4874_v6 = vpop.f32.mrb[31].mxu1 }
 0x865   :  { %v3542_v8 = vpop.f32.mrb[32].mxu1 }
 0x866   :  { %2331 = vrot.lane.b32.xlu0 %v3542_v8, %s4182_s24  ;;  %v2151_v18 = vpop.f32.mrb[33].mxu1 }
 0x867   :  { %v3749_v55 = vpack.c.bf16 %v3542_v8, %v2151_v18 }
 0x869   :  { %3750 = vmatprep.subr.bf16.mxu1 %v3749_v55 }
 0x86a   :  { %1392 = vrot.lane.b32.xlu0 %v4659_v30, %s4183_s27  ;;  %3752 = vmatpush3.bf16.msra.mxu1 %v3749_v55  ;;  %v3147_v30 = vld [vmem:[%s5046_s12 + $0x58] sm:$0xff] }
 0x86b   :  { %v3760_v7 = vpack.c.bf16 %v3147_v30, %v3146_v60  ;;  %v2830_v60 = vld [vmem:[%s5052_s18] sm:$0xff]  ;;  %v2831_v30 = vld [vmem:[%s5052_s18 + $0x8] sm:$0xff] }
 0x8d4   :  { %v4879_v57 = vpop.f32.mrb[30].mxu0 }
 0x8d5   :  { %v3531_v56 = vpop.f32.mrb[31].mxu0 }
 0x8d8   :  { %v2332_v9 = vpop.permute.xlu0 %2331 }
 0x8dc   :  { %v2234_v61 = vpop.f32.mrb[32].mxu0  ;;  %v1393_v10 = vpop.permute.xlu0 %1392 }
 0x8dd   :  { %v3827_v3 = vpack.i.bf16 %v2151_v18, %v2234_v61  ;;  %v3553_v4 = vpop.f32.mrb[33].mxu0  ;;  %3558 = vmatprep.subr.mxu1 %v2234_v61  ;;  %v1474_v14 = vadd.f32 %v4794_v53, %v1393_v10 }
 0x8de   :  { %3559 = vmatpush3.msra.mxu1 %v2234_v61  ;;  %v2832_v61 = vld [vmem:[%s5052_s18 + $0x10] sm:$0xff] }
 0x8df   :  { %3828 = vrot.lane.b32.xlu1 %v3827_v3, %s4182_s24  ;;  %3561 = vmatmul.mubr.msk.f32.vlgmr.msra.gmra.mrb[34].mxu1 %vm1739_vm4, %v2240_v63  ;;  %v1563_v20 = vadd.f32 %v3115_v15, %v1474_v14  ;;  %v2835_v3 = vld [vmem:[%s5052_s18 + $0x28] sm:$0xff] }
 0x8e0   :  { %3757 = vmatprep.subr.bf16.mxu1 %v3756_v2 }
 0x8e1   :  { %3759 = vmatpush3.bf16.msra.mxu1 %v3756_v2  ;;  %v1565_v37 = vmax.f32 %v1563_v20, 0.0  ;;  %v2834_v2 = vld [vmem:[%s5052_s18 + $0x20] sm:$0xff]  ;;  %v2928_v20 = vld [vmem:[%s5054_s20 + $0x8] sm:$0xff] }
 0x8e2   :  { %3761 = vmatprep.subr.bf16.mxu1 %v3760_v7  ;;  %v3785_v4 = vpack.c.bf16 %v2835_v3, %v2834_v2 }
 0x8e3   :  { %1390 = vrot.lane.b32.xlu1 %v4661_v31, %s4183_s27  ;;  %v3150_v31 = vld [vmem:[%s5047_s13 + $0x40] sm:$0xff] }
 0x8e5   :  { %3763 = vmatpush3.bf16.msra.mxu1 %v3760_v7 }
 0x8e7   :  { %1478 = vrot.lane.b32.xlu1 %v4655_v26, %s4183_s27  ;;  %v3151_v26 = vld [vmem:[%s5047_s13 + $0x48] sm:$0xff] }
 0x8e8   :  { %v3765_v23 = vpack.c.bf16 %v3151_v26, %v3150_v31 }
 0x951   :  { %v3829_v11 = vpop.permute.xlu1 %3828 }
 0x952   :  { %v3831_v12 = vunpack.i.h.bf16 %v3829_v11  ;;  %v3830_v13 = vunpack.i.l.bf16 %v3829_v11 }
 0x954   :  { %v3754_v16 = vpack.c.bf16 %v3831_v12, %v3830_v13  ;;  %v2599_v12 = vld [vmem:[#allocation13 + $0x10] sm:$0xff] }
 0x955   :  { %v1391_v17 = vpop.permute.xlu1 %1390 }
 0x956   :  { %v1469_v19 = vadd.f32 %v4796_v54, %v1391_v17  ;;  %3755 = vmatpush3.bf16.msra.mxu0 %v3754_v16  ;;  %v3158_v16 = vld [vmem:[#allocation14 + $0x2] ss:$0 sm:$0xff] }
 0x957   :  { %3567 = vmatprep.subr.mxu0 %v4179_v0 }
 0x958   :  { %v1562_v53 = vadd.f32 %v3115_v15, %v1469_v19  ;;  %v2927_v19 = vld [vmem:[%s5054_s20] sm:$0xff] }
 0x959   :  { %v1479_v27 = vpop.permute.xlu1 %1478 }
 0x95a   :  { %v1564_v33 = vmax.f32 %v1562_v53, 0.0  ;;  %v1551_v54 = vadd.f32 %v4798_v62, %v1479_v27  ;;  %3568 = vmatpush3.msra.mxu0 %v2332_v9  ;;  %v2929_v53 = vld [vmem:[%s5054_s20 + $0x10] sm:$0xff] }
 0x95b   :  { %3570 = vmatmul.mubr.msk.f32.vlgmr.msra.gmra.mrb[34].mxu0 %vm1739_vm4, %v2242_v21  ;;  %3764 = vmatprep.subr.bf16.mxu0 %v4181_v1 }
 0x95c   :  { %3580 = vmatprep.mubr.msk.f32.mxu1 %vm463_vm3, %v1564_v33  ;;  %3766 = vmatpush3.bf16.msra.mxu0 %v3765_v23  ;;  %v1574_v38 = vadd.f32 %v3116_v36, %v1551_v54  ;;  %v2930_v23 = vld [vmem:[%s5054_s20 + $0x18] sm:$0xff]  ;;  %v2931_v54 = vld [vmem:[%s5054_s20 + $0x20] sm:$0xff] }
 0x95d   :  { %3581 = vmatmul.mubr.msk.f32.vlgmr.msra.gmra.mrb[36].mxu1 %vm463_vm3, %v1565_v37  ;;  %3767 = vmatprep.subr.bf16.mxu0 %v4181_v1  ;;  %v3793_v33 = vpack.c.bf16 %v2930_v23, %v2929_v53  ;;  %v2932_v37 = vld [vmem:[%s5054_s20 + $0x28] sm:$0xff]  ;;  %s4185_s20 = smov [#allocation22]  }
 0x95e   :  { %3591 = vmatprep.mubr.msk.f32.mxu0 %vm4180_vm0, %v4179_v0  ;;  %v1575_v62 = vmax.f32 %v1574_v38, 0.0  ;;  %3600 = vmatprep.mubr.msk.f32.mxu1 %vm1739_vm4, %v2596_v44 }
 0x960   :  { %3769 = vmatpush3.bf16.msra.mxu0 %v3768_v25 }
 0x961   :  { %3774 = vmatprep.subr.bf16.mxu0 %v4181_v1 }
 0x963   :  { %3592 = vmatmul.mubr.msk.f32.vlgmr.msra.gmra.mrb[36].mxu0 %vm463_vm3, %v1575_v62  ;;  %v3796_v62 = vpack.c.bf16 %v2932_v37, %v2931_v54 }
 0x964   :  { %3609 = vmatprep.mubr.msk.f32.mxu0 %vm4180_vm0, %v4179_v0 }
 0x9b2   :  { %v3562_v39 = vpop.f32.mrb[34].mxu1 }
 0x9b3   :  { %v2321_v40 = vadd.f32 %v3562_v39, %v4872_v52  ;;  %v2315_v41 = vpop.f32.mrb[35].mxu1 }
 0x9b4   :  { %v2316_v42 = vadd.f32 %v2315_v41, %v4874_v6 }
 0x9b5   :  { %v2418_v59 = vadd.f32 %v3142_v49, %v2321_v40 }
 0x9b6   :  { %v2417_v5 = vadd.f32 %v3142_v49, %v2316_v42 }
 0x9b8   :  { %v2419_v56 = vmax.f32 %v2417_v5, 0.0 }
 0xa2e   :  { %v2405_v45 = vpop.f32.mrb[34].mxu0 }
 0xa2f   :  { %v4931_v46 = vadd.f32 %v2405_v45, %v4879_v57  ;;  %v3571_v47 = vpop.f32.mrb[35].mxu0 }
 0xa30   :  { %v3582_v48 = vpop.f32.mrb[36].mxu1 }
 0xa31   :  { %2696 = vrot.lane.b32.xlu1 %v3582_v48, %s4182_s24  ;;  %v2508_v50 = vpop.f32.mrb[37].mxu1  ;;  %v2429_v38 = vadd.f32 %v3143_v28, %v4931_v46 }
 0xa32   :  { %v3770_v51 = vpack.c.bf16 %v3582_v48, %v2508_v50  ;;  %v3159_v48 = vld [vmem:[#allocation16 + $0x2] ss:$0 sm:$0xff] }
 0xa33   :  { %v2430_v39 = vmax.f32 %v2429_v38, 0.0 }
 0xa34   :  { %3771 = vmatprep.subr.bf16.mxu1 %v3770_v51 }
 0xa35   :  { %2604 = vrot.lane.b32.xlu1 %v4872_v52, %s4182_s24  ;;  %3773 = vmatpush3.bf16.msra.mxu1 %v3770_v51  ;;  %v2420_v52 = vmax.f32 %v2418_v59, 0.0 }
 0xa36   :  { %v2591_v8 = vpop.f32.mrb[36].mxu0 }
 0xa37   :  { %v3832_v18 = vpack.i.bf16 %v2508_v50, %v2591_v8  ;;  %v3593_v55 = vpop.f32.mrb[37].mxu0  ;;  %3598 = vmatprep.subr.mxu1 %v2591_v8 }
 0xa38   :  { %v3160_v55 = vld [vmem:[#allocation19] ss:$0 sm:$0xff] }
 0xa39   :  { %2802 = vrot.lane.b32.xlu1 %v2419_v56, %s5079_s30  ;;  %3833 = vrot.lane.b32.xlu0 %v3832_v18, %s4182_s24 }
 0xa3a   :  { %3599 = vmatpush3.msra.mxu1 %v2591_v8 }
 0xa3b   :  { %3601 = vmatmul.mubr.msk.f32.vlgmr.msra.gmra.mrb[38].mxu1 %vm1739_vm4, %v2597_v58 }
 0xa3d   :  { %2602 = vrot.lane.b32.xlu0 %v4874_v6, %s4182_s24  ;;  %v3777_v6 = vpack.c.bf16 %v2831_v30, %v2830_v60 }
 0xa3f   :  { %3778 = vmatprep.subr.bf16.mxu1 %v3777_v6 }
 0xa40   :  { %3780 = vmatpush3.bf16.msra.mxu1 %v3777_v6 }
 0xa41   :  { %2702 = vrot.lane.b32.xlu0 %v4879_v57, %s4182_s24  ;;  %v2833_v57 = vld [vmem:[%s5052_s18 + $0x18] sm:$0xff] }
 0xa42   :  { %v3781_v63 = vpack.c.bf16 %v2833_v57, %v2832_v61 }
 0xa44   :  { %3782 = vmatprep.subr.bf16.mxu1 %v3781_v63 }
 0xa45   :  { %2804 = vrot.lane.b32.xlu0 %v2420_v52, %s5079_s30  ;;  %3784 = vmatpush3.bf16.msra.mxu1 %v3781_v63 }
 0xa46   :  { %3786 = vmatprep.subr.bf16.mxu1 %v3785_v4 }
 0xa49   :  { %3788 = vmatpush3.bf16.msra.mxu1 %v3785_v4 }
 0xaa3   :  { %v2697_v13 = vpop.permute.xlu1 %2696 }
 0xaa7   :  { %v2605_v14 = vpop.permute.xlu1 %2604 }
 0xaab   :  { %v3834_v7 = vpop.permute.xlu0 %3833  ;;  %v2803_v42 = vpop.permute.xlu1 %2802 }
 0xaac   :  { %v3836_v9 = vunpack.i.h.bf16 %v3834_v7  ;;  %v3835_v10 = vunpack.i.l.bf16 %v3834_v7  ;;  %v2816_v45 = vsel %vm250_vm2, %v1821_v35, %v2803_v42 }
 0xaae   :  { %v3775_v11 = vpack.c.bf16 %v3836_v9, %v3835_v10 }
 0xaaf   :  { %v2603_v17 = vpop.permute.xlu0 %2602 }
 0xab0   :  { %3776 = vmatpush3.bf16.msra.mxu0 %v3775_v11 }
 0xab1   :  { %3607 = vmatprep.subr.mxu0 %v4179_v0 }
 0xab3   :  { %v2703_v40 = vpop.permute.xlu0 %2702 }
 0xab4   :  { %3608 = vmatpush3.msra.mxu0 %v2697_v13 }
 0xab5   :  { %3610 = vmatmul.mubr.msk.f32.vlgmr.msra.gmra.mrb[38].mxu0 %vm1739_vm4, %v2599_v12  ;;  %3789 = vmatprep.subr.bf16.mxu0 %v4181_v1 }
 0xab6   :  { %3639 = vmatprep.mubr.msk.f32.mxu0 %vm4180_vm0, %v4179_v0  ;;  %v3790_v0 = vpack.c.bf16 %v2928_v20, %v2927_v19 }
 0xab7   :  { %v2805_v41 = vpop.permute.xlu0 %2804 }
 0xab8   :  { %3791 = vmatpush3.bf16.msra.mxu0 %v3790_v0 }
 0xab9   :  { %3792 = vmatprep.subr.bf16.mxu0 %v4181_v1 }
 0xabc   :  { %3794 = vmatpush3.bf16.msra.mxu0 %v3793_v33 }
 0xabd   :  { %3795 = vmatprep.subr.bf16.mxu0 %v4181_v1  ;;  %v2817_v1 = vsel %vm250_vm2, %v1822_v34, %v2805_v41 }
 0xac0   :  { %3797 = vmatpush3.bf16.msra.mxu0 %v3796_v62 }
 0xb0e   :  { %v3602_v15 = vpop.f32.mrb[38].mxu1 }
 0xb0f   :  { %v2686_v31 = vadd.f32 %v3602_v15, %v2605_v14  ;;  %v2680_v26 = vpop.f32.mrb[39].mxu1 }
 0xb10   :  { %v2681_v21 = vadd.f32 %v2680_v26, %v2603_v17 }
 0xb11   :  { %v2787_v27 = vadd.f32 %v3158_v16, %v2686_v31 }
 0xb12   :  { %v2786_v32 = vadd.f32 %v3158_v16, %v2681_v21 }
 0xb13   :  { %v2789_v36 = vmax.f32 %v2787_v27, 0.0 }
 0xb14   :  { %v2788_v25 = vmax.f32 %v2786_v32, 0.0 }
 0xb15   :  { %2812 = vrot.lane.b32.xlu0 %v2789_v36, %s4184_s29 }
 0xb16   :  { %2810 = vrot.lane.b32.xlu1 %v2788_v25, %s4184_s29 }
 0xb1a   :  { %2821 = vrot.lane.b32.xlu1 %v2430_v39, %s5079_s30  ;;  %s3019_s30 = sshll.u32 %s4185_s20, 4  ;;  %s3020_s30 = int_to_ptr.vmem [resolvable:$true] %s3019_s30 }
 0xb1b   :  { %s4101_s13 = scalar_lea.vmem %s3020_s30, 256  ;;  %p4106_p13 = scmp.lt.s32.totalorder %s3020_s30, %s3020_s30 }
 0xb1c   :  { %p4102_p12 = scmp.ne.s32.totalorder %s3020_s30, %s4101_s13  ;;  %p4107_p0 = scmp.lt.s32.totalorder %s4101_s13, %s4101_s13 }
 0xb1e   :  { %p4108_p1 = por %p4107_p0, %p4106_p13 }
 0xb20   :  { %p4109_p2 = pnand %p4108_p1, %p4102_p12 }
 0xb87   :  { %v2813_v44 = vpop.permute.xlu0 %2812 }
 0xb88   :  { %v2811_v46 = vpop.permute.xlu1 %2810  ;;  %v2774_v47 = vpop.f32.mrb[38].mxu0  ;;  %v2819_v5 = vsel %vm463_vm3, %v2817_v1, %v2813_v44 }
 0xb89   :  { %v2818_v49 = vsel %vm463_vm3, %v2816_v45, %v2811_v46  ;;  %v2775_v50 = vadd.f32 %v2774_v47, %v2703_v40  ;;  %v3611_v51 = vpop.f32.mrb[39].mxu0 }
 0xb8a   :  { %3624 = vmatprep.mubr.msk.f32.mxu1 %vm2843_vm5, %v2818_v49 }
 0xb8b   :  { %v2798_v8 = vadd.f32 %v3159_v48, %v2775_v50  ;;  %3625 = vmatmul.mubr.msk.f32.vlgmr.msra.gmra.mrb[40].mxu1 %vm2843_vm5, %v2819_v5 }
 0xb8c   :  { %v2822_v35 = vpop.permute.xlu1 %2821 }
 0xb8d   :  { %v2799_v29 = vmax.f32 %v2798_v8, 0.0  ;;  %v2828_v24 = vsel %vm250_vm2, %v1915_v22, %v2822_v35 }
 0xb8f   :  { %2825 = vrot.lane.b32.xlu0 %v2799_v29, %s4184_s29 }
 0xc01   :  { %v2826_v18 = vpop.permute.xlu0 %2825 }
 0xc02   :  { %v2829_v34 = vsel %vm463_vm3, %v2828_v24, %v2826_v18 }
 0xc03   :  { %3640 = vmatmul.mubr.msk.f32.vlgmr.msra.gmra.mrb[40].mxu0 %vm2843_vm5, %v2829_v34 }
 0xc5e   :  { %v3626_v56 = vpop.f32.mrb[40].mxu1 }
 0xc5f   :  { %v2922_v58 = vadd.f32 %v3626_v56, %v3160_v55  ;;  %v2916_v59 = vpop.f32.mrb[41].mxu1 }
 0xc60   :  { %v2917_v52 = vadd.f32 %v3160_v55, %v2916_v59 }
 0xc61   :  { %2926 = vst.msk [vmem:[#allocation22 + $0x8] sm:$0xff] %vm250_vm2, %v2922_v58 }
 0xc62   :  { %2925 = vst.msk [vmem:[#allocation22] sm:$0xff] %vm250_vm2, %v2917_v52 }
 0xc63   :  { %4112 = shalt.err (!%p4109_p2)
}
 0xc64   :  { %s4113_s21 = scalar_lea.hbm %s5056_s22, 256 }
 0xc65   :  { %p4114_p3 = scmp.ne.s32.totalorder %s5056_s22, %s4113_s21  ;;  %p4117_p4 = scmp.lt.u32.totalorder %s4113_s21, %s5056_s22 }
 0xc67   :  { %p4119_p5 = pnand %p4117_p4, %p4114_p3 }
 0xc69   :  { %4122 = shalt.err (!%p4119_p5)
}
 0xc6a   :  { %3025 = dma.vmem_to_hbm [thread:$0]  %s3020_s30, 256, %s5056_s22, [#allocation4], %s4165_s3, %s4165_s3, %s4166_s0   ;;  %v3163_v43 = vld [vmem:[#allocation20] ss:$0 sm:$0xff] }
 0xc6b   :  { %s4186_s14 = smov [#allocation23]  }
 0xc6c   :  { %s3032_s16 = sshll.u32 %s4186_s14, 4  ;;  %s3033_s16 = int_to_ptr.vmem [resolvable:$true] %s3032_s16 }
 0xc6d   :  { %s4123_s18 = scalar_lea.vmem %s3033_s16, 128  ;;  %p4128_p7 = scmp.lt.s32.totalorder %s3033_s16, %s3033_s16 }
 0xc6e   :  { %p4124_p6 = scmp.ne.s32.totalorder %s3033_s16, %s4123_s18  ;;  %p4129_p8 = scmp.lt.s32.totalorder %s4123_s18, %s4123_s18 }
 0xc70   :  { %p4130_p9 = por %p4129_p8, %p4128_p7 }
 0xc72   :  { %p4131_p10 = pnand %p4130_p9, %p4124_p6 }
 0xcd6   :  { %v3009_v22 = vpop.f32.mrb[40].mxu0 }
 0xcd7   :  { %v3010_v60 = vadd.f32 %v3163_v43, %v3009_v22  ;;  %v3641_v30 = vpop.f32.mrb[41].mxu0 }
 0xcd9   :  { %3013 = vst.msk [vmem:[#allocation23] sm:$0xff] %vm250_vm2, %v3010_v60 }
 0xcda   :  { %4134 = shalt.err (!%p4131_p10)
}
 0xcdb   :  { %s4135_s22 = scalar_lea.hbm %s5057_s23, 128 }
 0xcdc   :  { %p4136_p11 = scmp.ne.s32.totalorder %s5057_s23, %s4135_s22  ;;  %p4139_p12 = scmp.lt.u32.totalorder %s4135_s22, %s5057_s23 }
 0xcde   :  { %p4141_p13 = pnand %p4139_p12, %p4136_p11 }
 0xce0   :  { %4144 = shalt.err (!%p4141_p13)
}
 0xce1   :  { %3035 = dma.vmem_to_hbm [thread:$0]  %s3033_s16, 128, %s5057_s23, [#allocation24]  }
 0xce2   :  { %4159 = dma.done.wait [#allocation4], 256  }
 0xce3   :  { %4160 = vsyncadd [#allocation4], 4294967040 }
 0xce4   :  { %4161 = dma.done.wait [#allocation24], 128  }
 0xce5   :  { %4162 = vsyncadd [#allocation24], 4294967168 }
 0xce6   :  { %3042 = vsyncpa [#allocation3], 1 }
 0xce7   :  { %3043 = vsyncpa [#allocation6], 1 }
 0xce8   :  { %3044 = vsyncpa [#allocation9], 1 }
 0xce9   :  { %3045 = vsyncpa [#allocation12], 1 }
 0xcea   :  { %3046 = vsyncpa [#allocation15], 1 }
 0xceb   :  { %3047 = vsyncpa [#allocation18], 1 }
 0xcec   :  { %3048 = vsyncpa [#allocation21], 1 }
 0xced   :  { %3049 = vsyncpa [#allocation4], 1 }
 0xcee   :  { %3050 = vsyncpa [#allocation24], 1 }

</bundles_post_ra>
